<compile_context>
chip_gen: v6e
topology: v6e:2x2x1
jax: 0.10.0
libtpu: 0.0.40
codegen_flags: <defaults>
</compile_context>

<pallas_src>
import functools

import jax
import jax.numpy as jnp
from jax.experimental import pallas as pl
from jax.experimental.pallas import tpu as pltpu


# ---------------------------------------------------------------------------
# Fused CRNN forward kernel (one grid step = one time chunk of Tc steps)
# ---------------------------------------------------------------------------
def _crnn_kernel(xc_ref, wfused_ref, bfused_ref, whh_ref, bhn_ref,
                 out_ref, gx_sc, h_sc, *, chunk_len, batch_pad):
    """One time-chunk of the fused Conv1d+GRU forward.

    xc_ref    : (Tc*Bp, 3*C)   bf16  im2col conv input rows (t-major, then b)
    wfused_ref: (3*C, 3*Hp)    bf16  fused conv->input-projection weight
    bfused_ref: (1, 3*Hp)      f32   fused bias (b_conv@W_ih + b_ih + [b_hr|b_hz|0])
    whh_ref   : (Hp, 3*Hp)     bf16  GRU hidden->hidden weight (gates r|z|n)
    bhn_ref   : (1, Hp)        f32   n-gate hidden bias (stays inside r*(.))
    out_ref   : (Tc*Bp, Hp)    f32   hidden-sequence output block
    gx_sc     : (Tc*Bp, 3*Hp)  f32   scratch: hoisted input-projection gates
    h_sc      : (Bp, Hp)       f32   scratch: hidden state carried across chunks
    """
    Hp = h_sc.shape[1]

    @pl.when(pl.program_id(0) == 0)
    def _():
        h_sc[...] = jnp.zeros_like(h_sc)

    # ---- time-parallel stage: ONE matmul for conv + GRU input projection ----
    gx_sc[...] = (jnp.dot(xc_ref[...], wfused_ref[...],
                          preferred_element_type=jnp.float32)
                  + bfused_ref[...])

    # Hoist the n-gate hidden-bias broadcast out of the recurrent loop.
    bhn = jnp.broadcast_to(bhn_ref[...], (batch_pad, Hp))

    # ---- sequential recurrence: only h @ W_hh per timestep, h stays in vregs -
    def step(t, h):
        row = pl.multiple_of(t * batch_pad, batch_pad)       # sublane-aligned
        gxt = gx_sc[pl.ds(row, batch_pad), :]                 # (Bp, 3*Hp) f32
        gh = jnp.dot(h.astype(jnp.bfloat16), whh_ref[...],
                     preferred_element_type=jnp.float32)      # (Bp, 3*Hp) f32
        # PyTorch GRU gate order: r, z, n (each gate on its own 128-lane block)
        r = jax.nn.sigmoid(gxt[:, 0 * Hp:1 * Hp] + gh[:, 0 * Hp:1 * Hp])
        z = jax.nn.sigmoid(gxt[:, 1 * Hp:2 * Hp] + gh[:, 1 * Hp:2 * Hp])
        n = jnp.tanh(gxt[:, 2 * Hp:3 * Hp] + r * (gh[:, 2 * Hp:3 * Hp] + bhn))
        h_new = (1.0 - z) * n + z * h
        out_ref[pl.ds(row, batch_pad), :] = h_new             # unmasked (8,128)
        return h_new

    h0 = h_sc[...]
    h_final = jax.lax.fori_loop(0, chunk_len, step, h0,
                                unroll=min(8, chunk_len))
    h_sc[...] = h_final                                        # carry to next chunk


# ---------------------------------------------------------------------------
# Wrapper
# ---------------------------------------------------------------------------
def crnn_forward(x, packed, *, chunk_len=64):
    """x: (B, C, T) -> (B, T, hidden_size), matching CRNN.forward semantics."""
    B, C, T = x.shape
    H, Hp = packed["h"], packed["hp"]
    Bp = ((B + 7) // 8) * 8
    Tc = max(1, min(chunk_len, T))
    Tp = ((T + Tc - 1) // Tc) * Tc
    num_chunks = Tp // Tc

    # time-major, pad batch to Bp sublanes and time to a multiple of Tc
    x_tm = jnp.transpose(x, (2, 0, 1)).astype(jnp.float32)          # (T, B, C)
    x_tm = jnp.pad(x_tm, ((0, Tp - T), (0, Bp - B), (0, 0)))        # (Tp, Bp, C)
    # im2col for Conv1d(kernel=3, padding=1): columns [x_{t-1} | x_t | x_{t+1}]
    xz = jnp.pad(x_tm, ((1, 1), (0, 0), (0, 0)))                    # (Tp+2, Bp, C)
    xc = jnp.concatenate([xz[0:Tp], xz[1:Tp + 1], xz[2:Tp + 2]], axis=-1)
    xc = xc.reshape(Tp * Bp, 3 * C).astype(jnp.bfloat16)

    kernel = functools.partial(_crnn_kernel, chunk_len=Tc, batch_pad=Bp)
    out2d = pl.pallas_call(
        kernel,
        out_shape=jax.ShapeDtypeStruct((Tp * Bp, Hp), jnp.float32),
        grid=(num_chunks,),
        in_specs=[
            pl.BlockSpec((Tc * Bp, 3 * C), lambda c: (c, 0)),   # per-chunk input
            pl.BlockSpec((3 * C, 3 * Hp), lambda c: (0, 0)),    # fused weight
            pl.BlockSpec((1, 3 * Hp), lambda c: (0, 0)),        # fused bias
            pl.BlockSpec((Hp, 3 * Hp), lambda c: (0, 0)),       # W_hh
            pl.BlockSpec((1, Hp), lambda c: (0, 0)),            # b_hn
        ],
        out_specs=pl.BlockSpec((Tc * Bp, Hp), lambda c: (c, 0)),
        scratch_shapes=[
            pltpu.VMEM((Tc * Bp, 3 * Hp), jnp.float32),          # gx (per chunk)
            pltpu.VMEM((Bp, Hp), jnp.float32),                   # h carry
        ],
        compiler_params=pltpu.CompilerParams(
            dimension_semantics=("arbitrary",)),                 # serial recurrence
    )(xc, packed["wfused"], packed["bfused"], packed["whh"], packed["bhn"])

    out = out2d.reshape(Tp, Bp, Hp)[:T, :B, :H]                 # strip padding
    return jnp.transpose(out, (1, 0, 2))                        # (B, T, H)


# ---------------------------------------------------------------------------
# Parameters (PyTorch-default-style init) and TPU-friendly packing
# ---------------------------------------------------------------------------
def init_crnn_params(key, input_size, hidden_size):
    K = 3
    kwc, kbc, kwi, kbi, kwh, kbh = jax.random.split(key, 6)
    cb = 1.0 / (input_size * K) ** 0.5      # Conv1d default bound
    gb = 1.0 / hidden_size ** 0.5           # GRU default bound
    u = lambda k, shape, b: jax.random.uniform(k, shape, jnp.float32, -b, b)
    return {
        "w_conv": u(kwc, (hidden_size, input_size, K), cb),   # (H, C, 3)
        "b_conv": u(kbc, (hidden_size,), cb),                 # (H,)
        "w_ih": u(kwi, (3 * hidden_size, hidden_size), gb),   # (3H, H) rows r|z|n
        "b_ih": u(kbi, (3 * hidden_size,), gb),
        "w_hh": u(kwh, (3 * hidden_size, hidden_size), gb),
        "b_hh": u(kbh, (3 * hidden_size,), gb),
    }


def pack_crnn_params(raw, input_size, hidden_size):
    C, H, K = input_size, hidden_size, 3
    Hp = max(128, ((H + 127) // 128) * 128)   # pad hidden to full 128-lane blocks

    # Conv weight -> (K*C, Hp) matching im2col column order k*C + c.
    wc = jnp.transpose(raw["w_conv"], (2, 1, 0)).reshape(K * C, H)
    wc = jnp.pad(wc, ((0, 0), (0, Hp - H)))                   # (3C, Hp)
    bc = jnp.pad(raw["b_conv"], (0, Hp - H)).reshape(1, Hp)   # (1, Hp)

    def pack_w(w):  # (3H, Din) gate-major rows -> (Hp, 3*Hp); gate g at [g*Hp, g*Hp+H)
        din = w.shape[1]
        out = jnp.zeros((Hp, 3 * Hp), jnp.float32)
        for g in range(3):
            out = out.at[:din, g * Hp:g * Hp + H].set(w[g * H:(g + 1) * H, :].T)
        return out

    def pack_b(b):  # (3H,) -> (1, 3*Hp)
        out = jnp.zeros((1, 3 * Hp), jnp.float32)
        for g in range(3):
            out = out.at[0, g * Hp:g * Hp + H].set(b[g * H:(g + 1) * H])
        return out

    wih = pack_w(raw["w_ih"])
    bih = pack_b(raw["b_ih"])
    whh = pack_w(raw["w_hh"])
    bhh = pack_b(raw["b_hh"])

    # Algebraic fusion (exact in eval mode, computed in f32 on host):
    #   gx = (xc @ wc + bc) @ wih + bih  ==  xc @ (wc @ wih) + (bc @ wih + bih)
    wfused = wc @ wih                                         # (3C, 3Hp)
    bfused = bc @ wih + bih                                   # (1, 3Hp)
    # Fold r- and z-gate thirds of b_hh into the fused bias; b_hn stays in-loop.
    bfused = bfused.at[:, 0:2 * Hp].add(bhh[:, 0:2 * Hp])
    bhn = bhh[:, 2 * Hp:3 * Hp]                               # (1, Hp)

    return {
        "h": H, "hp": Hp,
        "wfused": wfused.astype(jnp.bfloat16),
        "bfused": bfused.astype(jnp.float32),
        "whh": whh.astype(jnp.bfloat16),
        "bhn": bhn.astype(jnp.float32),
    }


if __name__ == "__main__":
    # Small shapes consistent with the module: x is (B, input_size, seq_len).
    B, INPUT_SIZE, SEQ_LEN = 2, 4, 16
    HIDDEN = 32

    key = jax.random.PRNGKey(0)
    kx, kp = jax.random.split(key)
    x = jax.random.normal(kx, (B, INPUT_SIZE, SEQ_LEN), dtype=jnp.float32)

    raw = init_crnn_params(kp, INPUT_SIZE, HIDDEN)
    packed = pack_crnn_params(raw, INPUT_SIZE, HIDDEN)

    # chunk_len=8 -> grid=(2,) so the chunked/pipelined path is exercised.
    y = crnn_forward(x, packed, chunk_len=8)
    y = jax.block_until_ready(y)
    assert y.shape == (B, SEQ_LEN, HIDDEN), y.shape
    print("KERNEL_OK")
</pallas_src>

<mosaic_0001>
module attributes {stable_mosaic.version = 11 : i64} {
  func.func @_crnn_kernel(%arg0: i32, %arg1: memref<64x12xbf16, #tpu.memory_space<vmem>>, %arg2: memref<12x384xbf16, #tpu.memory_space<vmem>>, %arg3: memref<1x384xf32, #tpu.memory_space<vmem>>, %arg4: memref<128x384xbf16, #tpu.memory_space<vmem>>, %arg5: memref<1x128xf32, #tpu.memory_space<vmem>>, %arg6: memref<64x128xf32, #tpu.memory_space<vmem>>, %arg7: memref<64x384xf32, #tpu.memory_space<vmem>>, %arg8: memref<8x128xf32, #tpu.memory_space<vmem>>) attributes {dimension_semantics = [#tpu.dimension_semantics<arbitrary>], iteration_bounds = array<i64: 2>, scalar_prefetch = 0 : i64, scratch_operands = 2 : i64, tpu.core_type = #tpu.core_type<tc>, window_params = [{transform_indices = @transform_0, window_bounds = array<i64: 64, 12>}, {pipeline_mode = #tpu.pipeline_mode<synchronous>, transform_indices = @transform_1, window_bounds = array<i64: 12, 384>}, {pipeline_mode = #tpu.pipeline_mode<synchronous>, transform_indices = @transform_2, window_bounds = array<i64: 1, 384>}, {pipeline_mode = #tpu.pipeline_mode<synchronous>, transform_indices = @transform_3, window_bounds = array<i64: 128, 384>}, {pipeline_mode = #tpu.pipeline_mode<synchronous>, transform_indices = @transform_4, window_bounds = array<i64: 1, 128>}, {transform_indices = @transform_5, window_bounds = array<i64: 64, 128>}]} {
    %c0_i32 = arith.constant 0 : i32
    %0 = arith.cmpi eq, %arg0, %c0_i32 : i32
    %1 = arith.extui %0 : i1 to i32
    %c0_i32_0 = arith.constant 0 : i32
    %2 = arith.cmpi ne, %1, %c0_i32_0 : i32
    scf.if %2 {
      %cst_87 = arith.constant 0.000000e+00 : f32
      %303 = vector.broadcast %cst_87 : f32 to vector<8x128xf32>
      %c0_88 = arith.constant 0 : index
      %c0_89 = arith.constant 0 : index
      %304 = vector.load %arg8[%c0_88, %c0_89] : memref<8x128xf32, #tpu.memory_space<vmem>>, vector<8x128xf32>
      tpu.vector_store %arg8[%c0_88, %c0_89], %303 {strides = array<i32>} : memref<8x128xf32, #tpu.memory_space<vmem>>, vector<8x128xf32>,
    } else {
    }
    %c0 = arith.constant 0 : index
    %c0_1 = arith.constant 0 : index
    %3 = vector.load %arg1[%c0, %c0_1] : memref<64x12xbf16, #tpu.memory_space<vmem>>, vector<64x12xbf16>
    %c0_2 = arith.constant 0 : index
    %c0_3 = arith.constant 0 : index
    %4 = vector.load %arg2[%c0_2, %c0_3] : memref<12x384xbf16, #tpu.memory_space<vmem>>, vector<12x384xbf16>
    %cst = arith.constant dense<0.000000e+00> : vector<64x384xf32>
    %5 = tpu.matmul %3, %4, %cst {dimension_numbers = #tpu.dot_dimension_numbers<[1], [0], [0], [1], [0, 0, 1, 1], [], []>} : vector<64x12xbf16>, vector<12x384xbf16>, vector<64x384xf32> -> vector<64x384xf32>
    %c0_4 = arith.constant 0 : index
    %c0_5 = arith.constant 0 : index
    %6 = vector.load %arg3[%c0_4, %c0_5] : memref<1x384xf32, #tpu.memory_space<vmem>>, vector<1x384xf32>
    %7 = vector.broadcast %6 : vector<1x384xf32> to vector<64x384xf32>
    %8 = arith.addf %5, %7 : vector<64x384xf32>
    %c0_6 = arith.constant 0 : index
    %c0_7 = arith.constant 0 : index
    %9 = vector.load %arg7[%c0_6, %c0_7] : memref<64x384xf32, #tpu.memory_space<vmem>>, vector<64x384xf32>
    tpu.vector_store %arg7[%c0_6, %c0_7], %8 {strides = array<i32>} : memref<64x384xf32, #tpu.memory_space<vmem>>, vector<64x384xf32>,
    %c0_8 = arith.constant 0 : index
    %c0_9 = arith.constant 0 : index
    %10 = vector.load %arg5[%c0_8, %c0_9] : memref<1x128xf32, #tpu.memory_space<vmem>>, vector<1x128xf32>
    %11 = vector.shape_cast %10 : vector<1x128xf32> to vector<1x128xf32>
    %12 = vector.broadcast %11 : vector<1x128xf32> to vector<8x128xf32>
    %c0_10 = arith.constant 0 : index
    %c0_11 = arith.constant 0 : index
    %13 = vector.load %arg8[%c0_10, %c0_11] : memref<8x128xf32, #tpu.memory_space<vmem>>, vector<8x128xf32>
    %c0_i32_12 = arith.constant 0 : i32
    %c8_i32 = arith.constant 8 : i32
    %14 = arith.muli %c0_i32_12, %c8_i32 : i32
    %15 = tpu.assume_multiple %14, 8 : i32
    %16 = arith.index_cast %15 : i32 to index
    %c0_13 = arith.constant 0 : index
    %17 = vector.load %arg7[%16, %c0_13] : memref<64x384xf32, #tpu.memory_space<vmem>>, vector<8x384xf32>
    %18 = arith.truncf %13 : vector<8x128xf32> to vector<8x128xbf16>
    %c0_14 = arith.constant 0 : index
    %c0_15 = arith.constant 0 : index
    %19 = vector.load %arg4[%c0_14, %c0_15] : memref<128x384xbf16, #tpu.memory_space<vmem>>, vector<128x384xbf16>
    %cst_16 = arith.constant dense<0.000000e+00> : vector<8x384xf32>
    %20 = tpu.matmul %18, %19, %cst_16 {dimension_numbers = #tpu.dot_dimension_numbers<[1], [0], [0], [1], [0, 0, 1, 1], [], []>} : vector<8x128xbf16>, vector<128x384xbf16>, vector<8x384xf32> -> vector<8x384xf32>
    %21 = vector.extract_strided_slice %17 {offsets = [0, 0], sizes = [8, 128], strides = [1, 1]} : vector<8x384xf32> to vector<8x128xf32>
    %22 = vector.extract_strided_slice %20 {offsets = [0, 0], sizes = [8, 128], strides = [1, 1]} : vector<8x384xf32> to vector<8x128xf32>
    %23 = arith.addf %21, %22 : vector<8x128xf32>
    %24 = arith.negf %23 : vector<8x128xf32>
    %25 = math.exp %24 : vector<8x128xf32>
    %cst_17 = arith.constant 1.000000e+00 : f32
    %26 = vector.broadcast %cst_17 : f32 to vector<8x128xf32>
    %27 = arith.addf %26, %25 : vector<8x128xf32>
    %28 = arith.divf %26, %27 : vector<8x128xf32>
    %29 = vector.extract_strided_slice %17 {offsets = [0, 128], sizes = [8, 128], strides = [1, 1]} : vector<8x384xf32> to vector<8x128xf32>
    %30 = vector.extract_strided_slice %20 {offsets = [0, 128], sizes = [8, 128], strides = [1, 1]} : vector<8x384xf32> to vector<8x128xf32>
    %31 = arith.addf %29, %30 : vector<8x128xf32>
    %32 = arith.negf %31 : vector<8x128xf32>
    %33 = math.exp %32 : vector<8x128xf32>
    %cst_18 = arith.constant 1.000000e+00 : f32
    %34 = vector.broadcast %cst_18 : f32 to vector<8x128xf32>
    %35 = arith.addf %34, %33 : vector<8x128xf32>
    %36 = arith.divf %34, %35 : vector<8x128xf32>
    %37 = vector.extract_strided_slice %17 {offsets = [0, 256], sizes = [8, 128], strides = [1, 1]} : vector<8x384xf32> to vector<8x128xf32>
    %38 = vector.extract_strided_slice %20 {offsets = [0, 256], sizes = [8, 128], strides = [1, 1]} : vector<8x384xf32> to vector<8x128xf32>
    %39 = arith.addf %38, %12 : vector<8x128xf32>
    %40 = arith.mulf %28, %39 : vector<8x128xf32>
    %41 = arith.addf %37, %40 : vector<8x128xf32>
    %42 = math.tanh %41 : vector<8x128xf32>
    %cst_19 = arith.constant 1.000000e+00 : f32
    %43 = vector.broadcast %cst_19 : f32 to vector<8x128xf32>
    %44 = arith.subf %43, %36 : vector<8x128xf32>
    %45 = arith.mulf %44, %42 : vector<8x128xf32>
    %46 = arith.mulf %36, %13 : vector<8x128xf32>
    %47 = arith.addf %45, %46 : vector<8x128xf32>
    %48 = arith.index_cast %15 : i32 to index
    %c0_20 = arith.constant 0 : index
    %49 = vector.load %arg6[%48, %c0_20] : memref<64x128xf32, #tpu.memory_space<vmem>>, vector<8x128xf32>
    tpu.vector_store %arg6[%48, %c0_20], %47 {strides = array<i32>} : memref<64x128xf32, #tpu.memory_space<vmem>>, vector<8x128xf32>,
    %c1_i32 = arith.constant 1 : i32
    %c8_i32_21 = arith.constant 8 : i32
    %50 = arith.muli %c1_i32, %c8_i32_21 : i32
    %51 = tpu.assume_multiple %50, 8 : i32
    %52 = arith.index_cast %51 : i32 to index
    %c0_22 = arith.constant 0 : index
    %53 = vector.load %arg7[%52, %c0_22] : memref<64x384xf32, #tpu.memory_space<vmem>>, vector<8x384xf32>
    %54 = arith.truncf %47 : vector<8x128xf32> to vector<8x128xbf16>
    %c0_23 = arith.constant 0 : index
    %c0_24 = arith.constant 0 : index
    %55 = vector.load %arg4[%c0_23, %c0_24] : memref<128x384xbf16, #tpu.memory_space<vmem>>, vector<128x384xbf16>
    %cst_25 = arith.constant dense<0.000000e+00> : vector<8x384xf32>
    %56 = tpu.matmul %54, %55, %cst_25 {dimension_numbers = #tpu.dot_dimension_numbers<[1], [0], [0], [1], [0, 0, 1, 1], [], []>} : vector<8x128xbf16>, vector<128x384xbf16>, vector<8x384xf32> -> vector<8x384xf32>
    %57 = vector.extract_strided_slice %53 {offsets = [0, 0], sizes = [8, 128], strides = [1, 1]} : vector<8x384xf32> to vector<8x128xf32>
    %58 = vector.extract_strided_slice %56 {offsets = [0, 0], sizes = [8, 128], strides = [1, 1]} : vector<8x384xf32> to vector<8x128xf32>
    %59 = arith.addf %57, %58 : vector<8x128xf32>
    %60 = arith.negf %59 : vector<8x128xf32>
    %61 = math.exp %60 : vector<8x128xf32>
    %cst_26 = arith.constant 1.000000e+00 : f32
    %62 = vector.broadcast %cst_26 : f32 to vector<8x128xf32>
    %63 = arith.addf %62, %61 : vector<8x128xf32>
    %64 = arith.divf %62, %63 : vector<8x128xf32>
    %65 = vector.extract_strided_slice %53 {offsets = [0, 128], sizes = [8, 128], strides = [1, 1]} : vector<8x384xf32> to vector<8x128xf32>
    %66 = vector.extract_strided_slice %56 {offsets = [0, 128], sizes = [8, 128], strides = [1, 1]} : vector<8x384xf32> to vector<8x128xf32>
    %67 = arith.addf %65, %66 : vector<8x128xf32>
    %68 = arith.negf %67 : vector<8x128xf32>
    %69 = math.exp %68 : vector<8x128xf32>
    %cst_27 = arith.constant 1.000000e+00 : f32
    %70 = vector.broadcast %cst_27 : f32 to vector<8x128xf32>
    %71 = arith.addf %70, %69 : vector<8x128xf32>
    %72 = arith.divf %70, %71 : vector<8x128xf32>
    %73 = vector.extract_strided_slice %53 {offsets = [0, 256], sizes = [8, 128], strides = [1, 1]} : vector<8x384xf32> to vector<8x128xf32>
    %74 = vector.extract_strided_slice %56 {offsets = [0, 256], sizes = [8, 128], strides = [1, 1]} : vector<8x384xf32> to vector<8x128xf32>
    %75 = arith.addf %74, %12 : vector<8x128xf32>
    %76 = arith.mulf %64, %75 : vector<8x128xf32>
    %77 = arith.addf %73, %76 : vector<8x128xf32>
    %78 = math.tanh %77 : vector<8x128xf32>
    %cst_28 = arith.constant 1.000000e+00 : f32
    %79 = vector.broadcast %cst_28 : f32 to vector<8x128xf32>
    %80 = arith.subf %79, %72 : vector<8x128xf32>
    %81 = arith.mulf %80, %78 : vector<8x128xf32>
    %82 = arith.mulf %72, %47 : vector<8x128xf32>
    %83 = arith.addf %81, %82 : vector<8x128xf32>
    %84 = arith.index_cast %51 : i32 to index
    %c0_29 = arith.constant 0 : index
    %85 = vector.load %arg6[%84, %c0_29] : memref<64x128xf32, #tpu.memory_space<vmem>>, vector<8x128xf32>
    tpu.vector_store %arg6[%84, %c0_29], %83 {strides = array<i32>} : memref<64x128xf32, #tpu.memory_space<vmem>>, vector<8x128xf32>,
    %c2_i32 = arith.constant 2 : i32
    %c8_i32_30 = arith.constant 8 : i32
    %86 = arith.muli %c2_i32, %c8_i32_30 : i32
    %87 = tpu.assume_multiple %86, 8 : i32
    %88 = arith.index_cast %87 : i32 to index
    %c0_31 = arith.constant 0 : index
    %89 = vector.load %arg7[%88, %c0_31] : memref<64x384xf32, #tpu.memory_space<vmem>>, vector<8x384xf32>
    %90 = arith.truncf %83 : vector<8x128xf32> to vector<8x128xbf16>
    %c0_32 = arith.constant 0 : index
    %c0_33 = arith.constant 0 : index
    %91 = vector.load %arg4[%c0_32, %c0_33] : memref<128x384xbf16, #tpu.memory_space<vmem>>, vector<128x384xbf16>
    %cst_34 = arith.constant dense<0.000000e+00> : vector<8x384xf32>
    %92 = tpu.matmul %90, %91, %cst_34 {dimension_numbers = #tpu.dot_dimension_numbers<[1], [0], [0], [1], [0, 0, 1, 1], [], []>} : vector<8x128xbf16>, vector<128x384xbf16>, vector<8x384xf32> -> vector<8x384xf32>
    %93 = vector.extract_strided_slice %89 {offsets = [0, 0], sizes = [8, 128], strides = [1, 1]} : vector<8x384xf32> to vector<8x128xf32>
    %94 = vector.extract_strided_slice %92 {offsets = [0, 0], sizes = [8, 128], strides = [1, 1]} : vector<8x384xf32> to vector<8x128xf32>
    %95 = arith.addf %93, %94 : vector<8x128xf32>
    %96 = arith.negf %95 : vector<8x128xf32>
    %97 = math.exp %96 : vector<8x128xf32>
    %cst_35 = arith.constant 1.000000e+00 : f32
    %98 = vector.broadcast %cst_35 : f32 to vector<8x128xf32>
    %99 = arith.addf %98, %97 : vector<8x128xf32>
    %100 = arith.divf %98, %99 : vector<8x128xf32>
    %101 = vector.extract_strided_slice %89 {offsets = [0, 128], sizes = [8, 128], strides = [1, 1]} : vector<8x384xf32> to vector<8x128xf32>
    %102 = vector.extract_strided_slice %92 {offsets = [0, 128], sizes = [8, 128], strides = [1, 1]} : vector<8x384xf32> to vector<8x128xf32>
    %103 = arith.addf %101, %102 : vector<8x128xf32>
    %104 = arith.negf %103 : vector<8x128xf32>
    %105 = math.exp %104 : vector<8x128xf32>
    %cst_36 = arith.constant 1.000000e+00 : f32
    %106 = vector.broadcast %cst_36 : f32 to vector<8x128xf32>
    %107 = arith.addf %106, %105 : vector<8x128xf32>
    %108 = arith.divf %106, %107 : vector<8x128xf32>
    %109 = vector.extract_strided_slice %89 {offsets = [0, 256], sizes = [8, 128], strides = [1, 1]} : vector<8x384xf32> to vector<8x128xf32>
    %110 = vector.extract_strided_slice %92 {offsets = [0, 256], sizes = [8, 128], strides = [1, 1]} : vector<8x384xf32> to vector<8x128xf32>
    %111 = arith.addf %110, %12 : vector<8x128xf32>
    %112 = arith.mulf %100, %111 : vector<8x128xf32>
    %113 = arith.addf %109, %112 : vector<8x128xf32>
    %114 = math.tanh %113 : vector<8x128xf32>
    %cst_37 = arith.constant 1.000000e+00 : f32
    %115 = vector.broadcast %cst_37 : f32 to vector<8x128xf32>
    %116 = arith.subf %115, %108 : vector<8x128xf32>
    %117 = arith.mulf %116, %114 : vector<8x128xf32>
    %118 = arith.mulf %108, %83 : vector<8x128xf32>
    %119 = arith.addf %117, %118 : vector<8x128xf32>
    %120 = arith.index_cast %87 : i32 to index
    %c0_38 = arith.constant 0 : index
    %121 = vector.load %arg6[%120, %c0_38] : memref<64x128xf32, #tpu.memory_space<vmem>>, vector<8x128xf32>
    tpu.vector_store %arg6[%120, %c0_38], %119 {strides = array<i32>} : memref<64x128xf32, #tpu.memory_space<vmem>>, vector<8x128xf32>,
    %c3_i32 = arith.constant 3 : i32
    %c8_i32_39 = arith.constant 8 : i32
    %122 = arith.muli %c3_i32, %c8_i32_39 : i32
    %123 = tpu.assume_multiple %122, 8 : i32
    %124 = arith.index_cast %123 : i32 to index
    %c0_40 = arith.constant 0 : index
    %125 = vector.load %arg7[%124, %c0_40] : memref<64x384xf32, #tpu.memory_space<vmem>>, vector<8x384xf32>
    %126 = arith.truncf %119 : vector<8x128xf32> to vector<8x128xbf16>
    %c0_41 = arith.constant 0 : index
    %c0_42 = arith.constant 0 : index
    %127 = vector.load %arg4[%c0_41, %c0_42] : memref<128x384xbf16, #tpu.memory_space<vmem>>, vector<128x384xbf16>
    %cst_43 = arith.constant dense<0.000000e+00> : vector<8x384xf32>
    %128 = tpu.matmul %126, %127, %cst_43 {dimension_numbers = #tpu.dot_dimension_numbers<[1], [0], [0], [1], [0, 0, 1, 1], [], []>} : vector<8x128xbf16>, vector<128x384xbf16>, vector<8x384xf32> -> vector<8x384xf32>
    %129 = vector.extract_strided_slice %125 {offsets = [0, 0], sizes = [8, 128], strides = [1, 1]} : vector<8x384xf32> to vector<8x128xf32>
    %130 = vector.extract_strided_slice %128 {offsets = [0, 0], sizes = [8, 128], strides = [1, 1]} : vector<8x384xf32> to vector<8x128xf32>
    %131 = arith.addf %129, %130 : vector<8x128xf32>
    %132 = arith.negf %131 : vector<8x128xf32>
    %133 = math.exp %132 : vector<8x128xf32>
    %cst_44 = arith.constant 1.000000e+00 : f32
    %134 = vector.broadcast %cst_44 : f32 to vector<8x128xf32>
    %135 = arith.addf %134, %133 : vector<8x128xf32>
    %136 = arith.divf %134, %135 : vector<8x128xf32>
    %137 = vector.extract_strided_slice %125 {offsets = [0, 128], sizes = [8, 128], strides = [1, 1]} : vector<8x384xf32> to vector<8x128xf32>
    %138 = vector.extract_strided_slice %128 {offsets = [0, 128], sizes = [8, 128], strides = [1, 1]} : vector<8x384xf32> to vector<8x128xf32>
    %139 = arith.addf %137, %138 : vector<8x128xf32>
    %140 = arith.negf %139 : vector<8x128xf32>
    %141 = math.exp %140 : vector<8x128xf32>
    %cst_45 = arith.constant 1.000000e+00 : f32
    %142 = vector.broadcast %cst_45 : f32 to vector<8x128xf32>
    %143 = arith.addf %142, %141 : vector<8x128xf32>
    %144 = arith.divf %142, %143 : vector<8x128xf32>
    %145 = vector.extract_strided_slice %125 {offsets = [0, 256], sizes = [8, 128], strides = [1, 1]} : vector<8x384xf32> to vector<8x128xf32>
    %146 = vector.extract_strided_slice %128 {offsets = [0, 256], sizes = [8, 128], strides = [1, 1]} : vector<8x384xf32> to vector<8x128xf32>
    %147 = arith.addf %146, %12 : vector<8x128xf32>
    %148 = arith.mulf %136, %147 : vector<8x128xf32>
    %149 = arith.addf %145, %148 : vector<8x128xf32>
    %150 = math.tanh %149 : vector<8x128xf32>
    %cst_46 = arith.constant 1.000000e+00 : f32
    %151 = vector.broadcast %cst_46 : f32 to vector<8x128xf32>
    %152 = arith.subf %151, %144 : vector<8x128xf32>
    %153 = arith.mulf %152, %150 : vector<8x128xf32>
    %154 = arith.mulf %144, %119 : vector<8x128xf32>
    %155 = arith.addf %153, %154 : vector<8x128xf32>
    %156 = arith.index_cast %123 : i32 to index
    %c0_47 = arith.constant 0 : index
    %157 = vector.load %arg6[%156, %c0_47] : memref<64x128xf32, #tpu.memory_space<vmem>>, vector<8x128xf32>
    tpu.vector_store %arg6[%156, %c0_47], %155 {strides = array<i32>} : memref<64x128xf32, #tpu.memory_space<vmem>>, vector<8x128xf32>,
    %c4_i32 = arith.constant 4 : i32
    %c8_i32_48 = arith.constant 8 : i32
    %158 = arith.muli %c4_i32, %c8_i32_48 : i32
    %159 = tpu.assume_multiple %158, 8 : i32
    %160 = arith.index_cast %159 : i32 to index
    %c0_49 = arith.constant 0 : index
    %161 = vector.load %arg7[%160, %c0_49] : memref<64x384xf32, #tpu.memory_space<vmem>>, vector<8x384xf32>
    %162 = arith.truncf %155 : vector<8x128xf32> to vector<8x128xbf16>
    %c0_50 = arith.constant 0 : index
    %c0_51 = arith.constant 0 : index
    %163 = vector.load %arg4[%c0_50, %c0_51] : memref<128x384xbf16, #tpu.memory_space<vmem>>, vector<128x384xbf16>
    %cst_52 = arith.constant dense<0.000000e+00> : vector<8x384xf32>
    %164 = tpu.matmul %162, %163, %cst_52 {dimension_numbers = #tpu.dot_dimension_numbers<[1], [0], [0], [1], [0, 0, 1, 1], [], []>} : vector<8x128xbf16>, vector<128x384xbf16>, vector<8x384xf32> -> vector<8x384xf32>
    %165 = vector.extract_strided_slice %161 {offsets = [0, 0], sizes = [8, 128], strides = [1, 1]} : vector<8x384xf32> to vector<8x128xf32>
    %166 = vector.extract_strided_slice %164 {offsets = [0, 0], sizes = [8, 128], strides = [1, 1]} : vector<8x384xf32> to vector<8x128xf32>
    %167 = arith.addf %165, %166 : vector<8x128xf32>
    %168 = arith.negf %167 : vector<8x128xf32>
    %169 = math.exp %168 : vector<8x128xf32>
    %cst_53 = arith.constant 1.000000e+00 : f32
    %170 = vector.broadcast %cst_53 : f32 to vector<8x128xf32>
    %171 = arith.addf %170, %169 : vector<8x128xf32>
    %172 = arith.divf %170, %171 : vector<8x128xf32>
    %173 = vector.extract_strided_slice %161 {offsets = [0, 128], sizes = [8, 128], strides = [1, 1]} : vector<8x384xf32> to vector<8x128xf32>
    %174 = vector.extract_strided_slice %164 {offsets = [0, 128], sizes = [8, 128], strides = [1, 1]} : vector<8x384xf32> to vector<8x128xf32>
    %175 = arith.addf %173, %174 : vector<8x128xf32>
    %176 = arith.negf %175 : vector<8x128xf32>
    %177 = math.exp %176 : vector<8x128xf32>
    %cst_54 = arith.constant 1.000000e+00 : f32
    %178 = vector.broadcast %cst_54 : f32 to vector<8x128xf32>
    %179 = arith.addf %178, %177 : vector<8x128xf32>
    %180 = arith.divf %178, %179 : vector<8x128xf32>
    %181 = vector.extract_strided_slice %161 {offsets = [0, 256], sizes = [8, 128], strides = [1, 1]} : vector<8x384xf32> to vector<8x128xf32>
    %182 = vector.extract_strided_slice %164 {offsets = [0, 256], sizes = [8, 128], strides = [1, 1]} : vector<8x384xf32> to vector<8x128xf32>
    %183 = arith.addf %182, %12 : vector<8x128xf32>
    %184 = arith.mulf %172, %183 : vector<8x128xf32>
    %185 = arith.addf %181, %184 : vector<8x128xf32>
    %186 = math.tanh %185 : vector<8x128xf32>
    %cst_55 = arith.constant 1.000000e+00 : f32
    %187 = vector.broadcast %cst_55 : f32 to vector<8x128xf32>
    %188 = arith.subf %187, %180 : vector<8x128xf32>
    %189 = arith.mulf %188, %186 : vector<8x128xf32>
    %190 = arith.mulf %180, %155 : vector<8x128xf32>
    %191 = arith.addf %189, %190 : vector<8x128xf32>
    %192 = arith.index_cast %159 : i32 to index
    %c0_56 = arith.constant 0 : index
    %193 = vector.load %arg6[%192, %c0_56] : memref<64x128xf32, #tpu.memory_space<vmem>>, vector<8x128xf32>
    tpu.vector_store %arg6[%192, %c0_56], %191 {strides = array<i32>} : memref<64x128xf32, #tpu.memory_space<vmem>>, vector<8x128xf32>,
    %c5_i32 = arith.constant 5 : i32
    %c8_i32_57 = arith.constant 8 : i32
    %194 = arith.muli %c5_i32, %c8_i32_57 : i32
    %195 = tpu.assume_multiple %194, 8 : i32
    %196 = arith.index_cast %195 : i32 to index
    %c0_58 = arith.constant 0 : index
    %197 = vector.load %arg7[%196, %c0_58] : memref<64x384xf32, #tpu.memory_space<vmem>>, vector<8x384xf32>
    %198 = arith.truncf %191 : vector<8x128xf32> to vector<8x128xbf16>
    %c0_59 = arith.constant 0 : index
    %c0_60 = arith.constant 0 : index
    %199 = vector.load %arg4[%c0_59, %c0_60] : memref<128x384xbf16, #tpu.memory_space<vmem>>, vector<128x384xbf16>
    %cst_61 = arith.constant dense<0.000000e+00> : vector<8x384xf32>
    %200 = tpu.matmul %198, %199, %cst_61 {dimension_numbers = #tpu.dot_dimension_numbers<[1], [0], [0], [1], [0, 0, 1, 1], [], []>} : vector<8x128xbf16>, vector<128x384xbf16>, vector<8x384xf32> -> vector<8x384xf32>
    %201 = vector.extract_strided_slice %197 {offsets = [0, 0], sizes = [8, 128], strides = [1, 1]} : vector<8x384xf32> to vector<8x128xf32>
    %202 = vector.extract_strided_slice %200 {offsets = [0, 0], sizes = [8, 128], strides = [1, 1]} : vector<8x384xf32> to vector<8x128xf32>
    %203 = arith.addf %201, %202 : vector<8x128xf32>
    %204 = arith.negf %203 : vector<8x128xf32>
    %205 = math.exp %204 : vector<8x128xf32>
    %cst_62 = arith.constant 1.000000e+00 : f32
    %206 = vector.broadcast %cst_62 : f32 to vector<8x128xf32>
    %207 = arith.addf %206, %205 : vector<8x128xf32>
    %208 = arith.divf %206, %207 : vector<8x128xf32>
    %209 = vector.extract_strided_slice %197 {offsets = [0, 128], sizes = [8, 128], strides = [1, 1]} : vector<8x384xf32> to vector<8x128xf32>
    %210 = vector.extract_strided_slice %200 {offsets = [0, 128], sizes = [8, 128], strides = [1, 1]} : vector<8x384xf32> to vector<8x128xf32>
    %211 = arith.addf %209, %210 : vector<8x128xf32>
    %212 = arith.negf %211 : vector<8x128xf32>
    %213 = math.exp %212 : vector<8x128xf32>
    %cst_63 = arith.constant 1.000000e+00 : f32
    %214 = vector.broadcast %cst_63 : f32 to vector<8x128xf32>
    %215 = arith.addf %214, %213 : vector<8x128xf32>
    %216 = arith.divf %214, %215 : vector<8x128xf32>
    %217 = vector.extract_strided_slice %197 {offsets = [0, 256], sizes = [8, 128], strides = [1, 1]} : vector<8x384xf32> to vector<8x128xf32>
    %218 = vector.extract_strided_slice %200 {offsets = [0, 256], sizes = [8, 128], strides = [1, 1]} : vector<8x384xf32> to vector<8x128xf32>
    %219 = arith.addf %218, %12 : vector<8x128xf32>
    %220 = arith.mulf %208, %219 : vector<8x128xf32>
    %221 = arith.addf %217, %220 : vector<8x128xf32>
    %222 = math.tanh %221 : vector<8x128xf32>
    %cst_64 = arith.constant 1.000000e+00 : f32
    %223 = vector.broadcast %cst_64 : f32 to vector<8x128xf32>
    %224 = arith.subf %223, %216 : vector<8x128xf32>
    %225 = arith.mulf %224, %222 : vector<8x128xf32>
    %226 = arith.mulf %216, %191 : vector<8x128xf32>
    %227 = arith.addf %225, %226 : vector<8x128xf32>
    %228 = arith.index_cast %195 : i32 to index
    %c0_65 = arith.constant 0 : index
    %229 = vector.load %arg6[%228, %c0_65] : memref<64x128xf32, #tpu.memory_space<vmem>>, vector<8x128xf32>
    tpu.vector_store %arg6[%228, %c0_65], %227 {strides = array<i32>} : memref<64x128xf32, #tpu.memory_space<vmem>>, vector<8x128xf32>,
    %c6_i32 = arith.constant 6 : i32
    %c8_i32_66 = arith.constant 8 : i32
    %230 = arith.muli %c6_i32, %c8_i32_66 : i32
    %231 = tpu.assume_multiple %230, 8 : i32
    %232 = arith.index_cast %231 : i32 to index
    %c0_67 = arith.constant 0 : index
    %233 = vector.load %arg7[%232, %c0_67] : memref<64x384xf32, #tpu.memory_space<vmem>>, vector<8x384xf32>
    %234 = arith.truncf %227 : vector<8x128xf32> to vector<8x128xbf16>
    %c0_68 = arith.constant 0 : index
    %c0_69 = arith.constant 0 : index
    %235 = vector.load %arg4[%c0_68, %c0_69] : memref<128x384xbf16, #tpu.memory_space<vmem>>, vector<128x384xbf16>
    %cst_70 = arith.constant dense<0.000000e+00> : vector<8x384xf32>
    %236 = tpu.matmul %234, %235, %cst_70 {dimension_numbers = #tpu.dot_dimension_numbers<[1], [0], [0], [1], [0, 0, 1, 1], [], []>} : vector<8x128xbf16>, vector<128x384xbf16>, vector<8x384xf32> -> vector<8x384xf32>
    %237 = vector.extract_strided_slice %233 {offsets = [0, 0], sizes = [8, 128], strides = [1, 1]} : vector<8x384xf32> to vector<8x128xf32>
    %238 = vector.extract_strided_slice %236 {offsets = [0, 0], sizes = [8, 128], strides = [1, 1]} : vector<8x384xf32> to vector<8x128xf32>
    %239 = arith.addf %237, %238 : vector<8x128xf32>
    %240 = arith.negf %239 : vector<8x128xf32>
    %241 = math.exp %240 : vector<8x128xf32>
    %cst_71 = arith.constant 1.000000e+00 : f32
    %242 = vector.broadcast %cst_71 : f32 to vector<8x128xf32>
    %243 = arith.addf %242, %241 : vector<8x128xf32>
    %244 = arith.divf %242, %243 : vector<8x128xf32>
    %245 = vector.extract_strided_slice %233 {offsets = [0, 128], sizes = [8, 128], strides = [1, 1]} : vector<8x384xf32> to vector<8x128xf32>
    %246 = vector.extract_strided_slice %236 {offsets = [0, 128], sizes = [8, 128], strides = [1, 1]} : vector<8x384xf32> to vector<8x128xf32>
    %247 = arith.addf %245, %246 : vector<8x128xf32>
    %248 = arith.negf %247 : vector<8x128xf32>
    %249 = math.exp %248 : vector<8x128xf32>
    %cst_72 = arith.constant 1.000000e+00 : f32
    %250 = vector.broadcast %cst_72 : f32 to vector<8x128xf32>
    %251 = arith.addf %250, %249 : vector<8x128xf32>
    %252 = arith.divf %250, %251 : vector<8x128xf32>
    %253 = vector.extract_strided_slice %233 {offsets = [0, 256], sizes = [8, 128], strides = [1, 1]} : vector<8x384xf32> to vector<8x128xf32>
    %254 = vector.extract_strided_slice %236 {offsets = [0, 256], sizes = [8, 128], strides = [1, 1]} : vector<8x384xf32> to vector<8x128xf32>
    %255 = arith.addf %254, %12 : vector<8x128xf32>
    %256 = arith.mulf %244, %255 : vector<8x128xf32>
    %257 = arith.addf %253, %256 : vector<8x128xf32>
    %258 = math.tanh %257 : vector<8x128xf32>
    %cst_73 = arith.constant 1.000000e+00 : f32
    %259 = vector.broadcast %cst_73 : f32 to vector<8x128xf32>
    %260 = arith.subf %259, %252 : vector<8x128xf32>
    %261 = arith.mulf %260, %258 : vector<8x128xf32>
    %262 = arith.mulf %252, %227 : vector<8x128xf32>
    %263 = arith.addf %261, %262 : vector<8x128xf32>
    %264 = arith.index_cast %231 : i32 to index
    %c0_74 = arith.constant 0 : index
    %265 = vector.load %arg6[%264, %c0_74] : memref<64x128xf32, #tpu.memory_space<vmem>>, vector<8x128xf32>
    tpu.vector_store %arg6[%264, %c0_74], %263 {strides = array<i32>} : memref<64x128xf32, #tpu.memory_space<vmem>>, vector<8x128xf32>,
    %c7_i32 = arith.constant 7 : i32
    %c8_i32_75 = arith.constant 8 : i32
    %266 = arith.muli %c7_i32, %c8_i32_75 : i32
    %267 = tpu.assume_multiple %266, 8 : i32
    %268 = arith.index_cast %267 : i32 to index
    %c0_76 = arith.constant 0 : index
    %269 = vector.load %arg7[%268, %c0_76] : memref<64x384xf32, #tpu.memory_space<vmem>>, vector<8x384xf32>
    %270 = arith.truncf %263 : vector<8x128xf32> to vector<8x128xbf16>
    %c0_77 = arith.constant 0 : index
    %c0_78 = arith.constant 0 : index
    %271 = vector.load %arg4[%c0_77, %c0_78] : memref<128x384xbf16, #tpu.memory_space<vmem>>, vector<128x384xbf16>
    %cst_79 = arith.constant dense<0.000000e+00> : vector<8x384xf32>
    %272 = tpu.matmul %270, %271, %cst_79 {dimension_numbers = #tpu.dot_dimension_numbers<[1], [0], [0], [1], [0, 0, 1, 1], [], []>} : vector<8x128xbf16>, vector<128x384xbf16>, vector<8x384xf32> -> vector<8x384xf32>
    %273 = vector.extract_strided_slice %269 {offsets = [0, 0], sizes = [8, 128], strides = [1, 1]} : vector<8x384xf32> to vector<8x128xf32>
    %274 = vector.extract_strided_slice %272 {offsets = [0, 0], sizes = [8, 128], strides = [1, 1]} : vector<8x384xf32> to vector<8x128xf32>
    %275 = arith.addf %273, %274 : vector<8x128xf32>
    %276 = arith.negf %275 : vector<8x128xf32>
    %277 = math.exp %276 : vector<8x128xf32>
    %cst_80 = arith.constant 1.000000e+00 : f32
    %278 = vector.broadcast %cst_80 : f32 to vector<8x128xf32>
    %279 = arith.addf %278, %277 : vector<8x128xf32>
    %280 = arith.divf %278, %279 : vector<8x128xf32>
    %281 = vector.extract_strided_slice %269 {offsets = [0, 128], sizes = [8, 128], strides = [1, 1]} : vector<8x384xf32> to vector<8x128xf32>
    %282 = vector.extract_strided_slice %272 {offsets = [0, 128], sizes = [8, 128], strides = [1, 1]} : vector<8x384xf32> to vector<8x128xf32>
    %283 = arith.addf %281, %282 : vector<8x128xf32>
    %284 = arith.negf %283 : vector<8x128xf32>
    %285 = math.exp %284 : vector<8x128xf32>
    %cst_81 = arith.constant 1.000000e+00 : f32
    %286 = vector.broadcast %cst_81 : f32 to vector<8x128xf32>
    %287 = arith.addf %286, %285 : vector<8x128xf32>
    %288 = arith.divf %286, %287 : vector<8x128xf32>
    %289 = vector.extract_strided_slice %269 {offsets = [0, 256], sizes = [8, 128], strides = [1, 1]} : vector<8x384xf32> to vector<8x128xf32>
    %290 = vector.extract_strided_slice %272 {offsets = [0, 256], sizes = [8, 128], strides = [1, 1]} : vector<8x384xf32> to vector<8x128xf32>
    %291 = arith.addf %290, %12 : vector<8x128xf32>
    %292 = arith.mulf %280, %291 : vector<8x128xf32>
    %293 = arith.addf %289, %292 : vector<8x128xf32>
    %294 = math.tanh %293 : vector<8x128xf32>
    %cst_82 = arith.constant 1.000000e+00 : f32
    %295 = vector.broadcast %cst_82 : f32 to vector<8x128xf32>
    %296 = arith.subf %295, %288 : vector<8x128xf32>
    %297 = arith.mulf %296, %294 : vector<8x128xf32>
    %298 = arith.mulf %288, %263 : vector<8x128xf32>
    %299 = arith.addf %297, %298 : vector<8x128xf32>
    %300 = arith.index_cast %267 : i32 to index
    %c0_83 = arith.constant 0 : index
    %301 = vector.load %arg6[%300, %c0_83] : memref<64x128xf32, #tpu.memory_space<vmem>>, vector<8x128xf32>
    tpu.vector_store %arg6[%300, %c0_83], %299 {strides = array<i32>} : memref<64x128xf32, #tpu.memory_space<vmem>>, vector<8x128xf32>,
    %c8_i32_84 = arith.constant 8 : i32
    %c0_85 = arith.constant 0 : index
    %c0_86 = arith.constant 0 : index
    %302 = vector.load %arg8[%c0_85, %c0_86] : memref<8x128xf32, #tpu.memory_space<vmem>>, vector<8x128xf32>
    tpu.vector_store %arg8[%c0_85, %c0_86], %299 {strides = array<i32>} : memref<8x128xf32, #tpu.memory_space<vmem>>, vector<8x128xf32>,
    return
  }
  func.func @transform_0(%arg0: i32) -> (i32, i32) {
    %c0_i32 = arith.constant 0 : i32
    %c0_i32_0 = arith.constant 0 : i32
    return %arg0, %c0_i32 : i32, i32
  }
  func.func @transform_1(%arg0: i32) -> (i32, i32) {
    %c0_i32 = arith.constant 0 : i32
    %c0_i32_0 = arith.constant 0 : i32
    %c0_i32_1 = arith.constant 0 : i32
    return %c0_i32, %c0_i32_0 : i32, i32
  }
  func.func @transform_2(%arg0: i32) -> (i32, i32) {
    %c0_i32 = arith.constant 0 : i32
    %c0_i32_0 = arith.constant 0 : i32
    %c0_i32_1 = arith.constant 0 : i32
    return %c0_i32, %c0_i32_0 : i32, i32
  }
  func.func @transform_3(%arg0: i32) -> (i32, i32) {
    %c0_i32 = arith.constant 0 : i32
    %c0_i32_0 = arith.constant 0 : i32
    %c0_i32_1 = arith.constant 0 : i32
    return %c0_i32, %c0_i32_0 : i32, i32
  }
  func.func @transform_4(%arg0: i32) -> (i32, i32) {
    %c0_i32 = arith.constant 0 : i32
    %c0_i32_0 = arith.constant 0 : i32
    %c0_i32_1 = arith.constant 0 : i32
    return %c0_i32, %c0_i32_0 : i32, i32
  }
  func.func @transform_5(%arg0: i32) -> (i32, i32) {
    %c0_i32 = arith.constant 0 : i32
    %c0_i32_0 = arith.constant 0 : i32
    return %arg0, %c0_i32 : i32, i32
  }
}

</mosaic_0001>

<bundles_post_ra>
// kernel: tpu_custom_call.1
= control target key start
LH: loop header
LB: loop body
LE: loop exit
PB: predicated region body
PF: predicated region fallthrough
CT: control target
= control target key end

     0   :  { %10 = vsyncpa [#allocation5], 0  ;;  %s4230_s0 = inlined_call_operand.vmem [shape: bf16[128,12], index: 0, kind: input, shape index: {}]   ;;  %s4231_s1 = inlined_call_operand.vmem [shape: bf16[12,384], index: 1, kind: input, shape index: {}]   ;;  %s4232_s2 = inlined_call_operand.vmem [shape: f32[1,384], index: 2, kind: input, shape index: {}]   ;;  %s4233_s3 = inlined_call_operand.hbm [shape: bf16[128,384], index: 3, kind: input, shape index: {}]   ;;  %s4234_s4 = inlined_call_operand.vmem [shape: f32[1,128], index: 4, kind: input, shape index: {}]   ;;  %s4235_s5 = inlined_call_operand.hbm [shape: f32[128,128], index: 5, kind: output, shape index: {}]  }
   0x1   :  { %11 = vsyncpa [#allocation6], 0 }
   0x2   :  { %13 = vsyncpa [#allocation6 + $0x1], 0  ;;  %s3660_s18 = smov 0   ;;  %s3662_s19 = smov 0  }
   0x3   :  { %s3664_s20 = smov 0   ;;  %s3666_s21 = smov 0  }
   0x4 LB: > { %s3681_s22 = sadd.s32 4294967295, %s3618_s21   ;;  %s2773_s23 = sadd.s32 4294967294, %s3618_s21   ;;  %s3618_s21 = sphi %s3666_s21, %s4244_s21   ;;  %s3614_s20 = sphi %s3664_s20, %s4243_s20   ;;  %s3610_s19 = sphi %s3662_s19, %s4242_s19   ;;  %s3606_s18 = sphi %s3660_s18, %s4241_s18  }
   0x5   : > { %s3685_s24 = sadd.s32 1, %s3618_s21   ;;  %s136_s25 = sadd.s32 1, %s3614_s20 }
   0x6   : > { %s133_s26 = ssub.s32 %s3618_s21, %s3685_s24  ;;  %p146_p0 = scmp.ne.s32.totalorder %s3614_s20, %s3610_s19 }
   0x7   : > { %p134_p1 = scmp.eq.s32.totalorder %s133_s26, 0  ;;  %p147_p2 = scmp.eq.s32.totalorder %s3681_s22, 1 }
   0x8   : > { %p152_p3 = scmp.ne.s32.totalorder %s3610_s19, %s3606_s18  ;;  %p153_p4 = scmp.eq.s32.totalorder %s2773_s23, 1 }
   0x9   : > { %s3696_s27 = scalar_select %p134_p1, %s3614_s20, %s136_s25  }
   0xa   : > { %p3698_p5 = por %p147_p2, %p146_p0  ;;  %p3702_p6 = por %p153_p4, %p152_p3 }
   0xb   : > { %p2774_p7 = scmp.ge.s32.totalorder %s3618_s21, 1  ;;  %p160_p8 = scmp.lt.s32.totalorder %s3618_s21, 3 }
   0xc   : > { %s4237_s29 = scalar_select %p3702_p6, 1, 0 }
   0xd   : > { %p3283_p10 = scmp.eq.s32.totalorder %s3681_s22, 0  ;;  %p3710_p11 = pnand %p2774_p7, %p160_p8 }
   0xe   : > { %s3620_s6 = smov [#allocation4]  }
   0xf   : > { %s178_s7 = sshll.u32 %s3620_s6, 4  ;;  %p3275_p12 = pneg %p3710_p11  ;;  %s179_s7 = int_to_ptr.vmem [resolvable:$true] %s178_s7 }
  0x10   : > { %s3539_s8 = scalar_lea.vmem %s179_s7, 3072  ;;  %p3547_p4 = scmp.lt.s32.totalorder %s179_s7, %s179_s7 }
  0x11   : > { %p3276_p13 = pnand %p3283_p10, %p3275_p12  ;;  %p3540_p1 = scmp.ne.s32.totalorder %s179_s7, %s3539_s8 }
  0x12   : > { %p3548_p9 = scmp.lt.s32.totalorder %s3539_s8, %s3539_s8 }
  0x13   : > { %p3530_p0 = pneg %p3276_p13 }
  0x14   : > { %p3549_p6 = por %p3548_p9, %p3547_p4 }
  0x15   : > { %p3542_p2 = pnand %p3540_p1, %p3530_p0 }
  0x17   : > { %p3543_p3 = pneg %p3542_p2 }
  0x19   : > { %p3550_p7 = pnand %p3549_p6, %p3543_p3 }
  0x1b   : > { %3553 = shalt.err (!%p3550_p7)
}
  0x1c   : > { %s3621_s9 = smov 192   ;;  %s3622_s10 = smov 12  }
  0x1d   : > { %3278 = dma.hbm_to_vmem [thread:$0]  (!%p3276_p13), %s4233_s3, 3072, %s179_s7, [#allocation5], %s3621_s9, %s3621_s9, %s3622_s10  }
  0x1e   : > { %206 = sbr.rel (%p3710_p11) target bundleno = 2105 (0x839), region = 40 }
  0x23   : > { %3597 = dma.done.wait (%p3283_p10), [#allocation5], 3072  }
  0x24   : > { %3599 = vsyncadd (%p3283_p10), [#allocation5], 4294964224  ;;  %s231_s13 = sand.u32 1, %s3610_s19   ;;  %s2780_s14 = sshll.u32 %s3681_s22, 3 }
  0x25   : > { %s2779_s15 = sshll.u32 %s231_s13, 6  ;;  %p235_p6 = scmp.lt.s32.totalorder %s2780_s14, 15 }
  0x26   : > { %s3736_s26 = scalar_lea.vmem [#allocation7], %s2779_s15  ;;  %p4239_p8 = scmp.ne.s32.totalorder %s3681_s22, 0 }
  0x27   : > { %s4246_s14 = smov (!%p235_p6, %s2780_s14), 15 }
  0x28   : > { %s2781_s16 = sshll.u32 %s4246_s14, 2  ;;  %245 = sbr.rel (%p4239_p8) target bundleno = 47 (0x2f), region = 48 }
  0x29   : > { %s3734_s25 = scalar_lea.vmem %s4230_s0, %s2781_s16 }
  0x2d   : > { %v3623_v0 = vmov 0.0  }
  0x2e   : > { %246 = vst [vmem:[#allocation3] sm:$0xff] %v3623_v0 }
  0x2f PF: > { %v3327_v1 = vld [vmem:[%s4231_s1 + $0x4] ss:$12 sps:$4 sm:$0x3f]   ;;  %vm322_vm0 = vcmask 1045504   ;;  %v3624_v4 = vmov 0   ;;  %vm309_vm1 = vcmask 97280   ;;  %v261_v46 = vlaneseq }
  0x30   : > { %v3329_v2 = vld [vmem:[%s4231_s1] ss:$12 sps:$4 sm:$0x3f]   ;;  %2790 = vmatprep.subr.msk.bf16.mxu0 %vm322_vm0, %v3327_v1  ;;  %364 = vmatprep.mubr.bf16.mxu0 %v3624_v4  ;;  %v3753_v7 = vld [vmem:[#allocation4 + $0xa8] ss:$12 sps:$4 sm:$0xff]   ;;  %v3625_v19 = vmov 0.0  }
  0x31   : > { %v3330_v3 = vld [vmem:[%s3734_s25] sm:$0xff]   ;;  %v324_v5 = vsel %vm322_vm0, %v3329_v2, 0  ;;  %v3756_v8 = vld [vmem:[#allocation4 + $0x94] ss:$12 sps:$4 sm:$0xff]   ;;  %v3770_v13 = vld [vmem:[#allocation4 + $0x64] ss:$12 sps:$4 sm:$0xff]  }
  0x32   : > { %v3750_v6 = vld [vmem:[#allocation4 + $0xac] ss:$12 sps:$4 sm:$0xff]   ;;  %3100 = vmatprep.mubr.msk.bf16.mxu1 %vm309_vm1, %v3330_v3  ;;  %347 = vmatpush1.bf16.msra.mxu0 %v324_v5  ;;  %v3760_v9 = vld [vmem:[#allocation4 + $0x90] ss:$12 sps:$4 sm:$0xff]   ;;  %v3337_v11 = vld [vmem:[%s3734_s25 + $0x8] sm:$0xff]   ;;  %vm3626_vm2 = vmmov 0  }
  0x33   : > { %669 = vmatprep.subr.bf16.mxu0 %v3750_v6  ;;  %v3764_v10 = vld [vmem:[#allocation4 + $0x7c] ss:$12 sps:$4 sm:$0xff]   ;;  %v3768_v12 = vld [vmem:[#allocation4 + $0x78] ss:$12 sps:$4 sm:$0xff]   ;;  %v3780_v16 = vld [vmem:[#allocation4 + $0x60] ss:$12 sps:$4 sm:$0xff]  }
  0x34   : > { %v3351_v14 = vld [vmem:[%s4231_s1 + $0x8] ss:$12 sps:$4 sm:$0x3f]   ;;  %v3359_v20 = vld [vmem:[#allocation4 + $0xb0] ss:$12 sps:$4 sm:$0xff]   ;;  %v262_v47 = vshrl.u32 %v261_v46, 7 }
  0x35   : > { %2791 = vmatmul.mubr.msk.bf16.vlgmr.msra.gmra.mxu0 %vm309_vm1, %v3330_v3  ;;  %3268 = vmatprep.subr.msk.bf16.mxu1 %vm322_vm0, %v3351_v14  ;;  %v330_v15 = vsel %vm322_vm0, %v3351_v14, 0  ;;  %v3784_v17 = vld [vmem:[#allocation4 + $0x4c] ss:$12 sps:$4 sm:$0xff]   ;;  %v3788_v21 = vld [vmem:[#allocation4 + $0x48] ss:$12 sps:$4 sm:$0xff]   ;;  %s3020_s23 = sshll.u32 %s3681_s22, 10 }
  0x36   : > { %670 = vmatpush1.bf16.msra.mxu0 %v3753_v7  ;;  %374 = vmatprep.mubr.bf16.mxu0 %v3624_v4  ;;  %v3344_v18 = vld [vmem:[%s3734_s25 + $0x10] sm:$0xff]   ;;  %v3791_v22 = vld [vmem:[#allocation4 + $0x34] ss:$12 sps:$4 sm:$0xff]   ;;  %v3360_v23 = vld [vmem:[#allocation4 + $0x98] ss:$12 sps:$4 sm:$0xff]   ;;  %v263_v48 = vsub.s32 0, %v262_v47  ;;  %s4183_s7 = scalar_lea.hbm %s4235_s5, %s3020_s23 }
  0x37   : > { %671 = vmatprep.subr.bf16.mxu0 %v3756_v8  ;;  %3099 = vmatpush3.bf16.msra.mxu1 %v330_v15  ;;  %v3798_v24 = vld [vmem:[#allocation4 + $0x30] ss:$12 sps:$4 sm:$0xff]   ;;  %v3361_v27 = vld [vmem:[#allocation4 + $0x80] ss:$12 sps:$4 sm:$0xff]   ;;  %v3806_v28 = vld [vmem:[#allocation4 + $0x18] ss:$12 sps:$4 sm:$0xff]  }
  0x38   : > { %3108 = vmatprep.subr.bf16.mxu1 %v3625_v19  ;;  %v3352_v25 = vld [vmem:[%s3734_s25 + $0x18] sm:$0xff]   ;;  %v3804_v26 = vld [vmem:[#allocation4 + $0x1c] ss:$12 sps:$4 sm:$0xff]   ;;  %v3814_v31 = vld [vmem:[#allocation4] ss:$12 sps:$4 sm:$0xff]   ;;  %v267_v51 = vsub.s32 1, %v262_v47 }
  0x39   : > { %v3809_v29 = vld [vmem:[#allocation4 + $0x4] ss:$12 sps:$4 sm:$0xff]   ;;  %v3362_v30 = vld [vmem:[#allocation4 + $0x68] ss:$12 sps:$4 sm:$0xff]   ;;  %v3816_v32 = vld [vmem:[#allocation3] sm:$0xff]  ;;  %v271_v58 = vsub.s32 2, %v262_v47 }
  0x3a   : > { %672 = vmatpush1.bf16.msra.mxu0 %v3760_v9  ;;  %3101 = vmatmul.mubr.msk.bf16.vlgmr.msra.gmra.mxu1 %vm309_vm1, %v3337_v11  ;;  %v3363_v33 = vld [vmem:[#allocation4 + $0x50] ss:$12 sps:$4 sm:$0xff]   ;;  %v508_v34 = vpack.c.bf16 %v3816_v32, %v3816_v32  ;;  %v3364_v35 = vld [vmem:[#allocation4 + $0x38] ss:$12 sps:$4 sm:$0xff]   ;;  %v3365_v36 = vld [vmem:[#allocation4 + $0x20] ss:$12 sps:$4 sm:$0xff]  }
  0x3b   : > { %673 = vmatprep.subr.bf16.mxu0 %v3764_v10  ;;  %3109 = vmatpush3.bf16.msra.mxu1 %v3359_v20  ;;  %v3366_v37 = vld [vmem:[#allocation4 + $0x8] ss:$12 sps:$4 sm:$0xff]   ;;  %v3367_v38 = vld [vmem:[#allocation4 + $0xb0] ss:$12 sps:$4 sm:$0xff]   ;;  %v3368_v39 = vld [vmem:[#allocation4 + $0x98] ss:$12 sps:$4 sm:$0xff]  }
  0x3c   : > { %3110 = vmatprep.subr.bf16.mxu1 %v3625_v19  ;;  %3104 = vmatprep.mubr.msk.bf16.mxu1 %vm309_vm1, %v3344_v18  ;;  %v3369_v40 = vld [vmem:[#allocation4 + $0x80] ss:$12 sps:$4 sm:$0xff]   ;;  %v3370_v41 = vld [vmem:[#allocation4 + $0x68] ss:$12 sps:$4 sm:$0xff]   ;;  %v3371_v42 = vld [vmem:[#allocation4 + $0x50] ss:$12 sps:$4 sm:$0xff]  }
  0x3d   : > { %2792 = vmatmul.mubr.msk.bf16.gmra.mxu0 %vm309_vm1, %v3337_v11  ;;  %v3372_v43 = vld [vmem:[#allocation4 + $0x38] ss:$12 sps:$4 sm:$0xff]   ;;  %v3373_v44 = vld [vmem:[#allocation4 + $0x20] ss:$12 sps:$4 sm:$0xff]   ;;  %v3374_v45 = vld [vmem:[#allocation4 + $0x8] ss:$12 sps:$4 sm:$0xff]  }
  0x3e   : > { %674 = vmatpush1.bf16.msra.mxu0 %v3768_v12  ;;  %384 = vmatprep.mubr.bf16.mxu0 %v3624_v4  ;;  %v259_v49 = vld [vmem:[%s4232_s2] sm:$0x7]  ;;  %s2692_s25 = sshll.u32 %s3736_s26, 4  ;;  %s4190_s8 = scalar_lea.sflag [#allocation6], %s231_s13  ;;  %s4185_s25 = int_to_ptr.vmem [resolvable:$true] %s2692_s25 }
  0x3f   : > { %675 = vmatprep.subr.bf16.mxu0 %v3770_v13  ;;  %3111 = vmatpush3.bf16.msra.mxu1 %v3360_v23  ;;  %v264_v53 = vrot.slane %v259_v49, %v263_v48  ;;  %v268_v55 = vrot.slane %v259_v49, %v267_v51  ;;  %v272_v63 = vrot.slane %v259_v49, %v271_v58  ;;  %s3554_s22 = scalar_lea.vmem %s4185_s25, 1024  ;;  %s3627_s9 = smov [#allocation7]  }
  0x40   : > { %3112 = vmatprep.subr.bf16.mxu1 %v3625_v19  ;;  %p3555_p9 = scmp.ne.s32.totalorder %s4185_s25, %s3554_s22  ;;  %s3558_s10 = sshll.u32 %s3627_s9, 4  ;;  %s3559_s10 = int_to_ptr.vmem [resolvable:$false] %s3558_s10 }
  0x41   : > { %s3560_s11 = scalar_lea.vmem %s3559_s10, 2048  ;;  %p3561_p12 = scmp.lt.s32.totalorder %s4185_s25, %s3559_s10 }
  0x42   : > { %676 = vmatpush1.bf16.msra.mxu0 %v3780_v16  ;;  %3105 = vmatmul.mubr.msk.bf16.gmra.mxu1 %vm309_vm1, %v3352_v25  ;;  %p3556_p10 = pnand %p3555_p9, %p3698_p5  ;;  %p3562_p13 = scmp.lt.s32.totalorder %s3560_s11, %s3554_s22 }
  0x43   : > { %677 = vmatprep.subr.bf16.mxu0 %v3784_v17  ;;  %3113 = vmatpush3.bf16.msra.mxu1 %v3361_v27 }
  0x44   : > { %3114 = vmatprep.subr.bf16.mxu1 %v3625_v19  ;;  %3124 = vmatprep.mubr.msk.bf16.mxu1 %vm3626_vm2, %v3625_v19  ;;  %p3557_p11 = pneg %p3556_p10  ;;  %p3563_p0 = por %p3562_p13, %p3561_p12 }
  0x45   : > { %2793 = vmatmul.mubr.msk.bf16.gmra.mxu0 %vm309_vm1, %v3344_v18 }
  0x46   : > { %678 = vmatpush1.bf16.msra.mxu0 %v3788_v21  ;;  %394 = vmatprep.mubr.bf16.mxu0 %v3624_v4  ;;  %p3564_p1 = pnand %p3563_p0, %p3557_p11 }
  0x47   : > { %679 = vmatprep.subr.bf16.mxu0 %v3791_v22  ;;  %3115 = vmatpush3.bf16.msra.mxu1 %v3362_v30 }
  0x48   : > { %3116 = vmatprep.subr.bf16.mxu1 %v3625_v19 }
  0x4a   : > { %680 = vmatpush1.bf16.msra.mxu0 %v3798_v24 }
  0x4b   : > { %681 = vmatprep.subr.bf16.mxu0 %v3804_v26  ;;  %3117 = vmatpush3.bf16.msra.mxu1 %v3363_v33 }
  0x4c   : > { %3118 = vmatprep.subr.bf16.mxu1 %v3625_v19 }
  0x4d   : > { %2794 = vmatmul.mubr.msk.bf16.gmra.mxu0 %vm309_vm1, %v3352_v25 }
  0x4e   : > { %682 = vmatpush1.bf16.msra.mxu0 %v3806_v28  ;;  %701 = vmatprep.mubr.bf16.mxu0 %v3624_v4 }
  0x4f   : > { %683 = vmatprep.subr.bf16.mxu0 %v3809_v29  ;;  %3119 = vmatpush3.bf16.msra.mxu1 %v3364_v35 }
  0x50   : > { %3120 = vmatprep.subr.bf16.mxu1 %v3625_v19 }
  0x52   : > { %684 = vmatpush1.bf16.msra.mxu0 %v3814_v31 }
  0x53   : > { %940 = vmatprep.subr.bf16.mxu0 %v3750_v6  ;;  %3121 = vmatpush3.bf16.msra.mxu1 %v3365_v36 }
  0x54   : > { %3122 = vmatprep.subr.bf16.mxu1 %v3625_v19 }
  0x55   : > { %702 = vmatmul.mubr.bf16.vlgmr.msra.gmra.mxu0 %v508_v34 }
  0x56   : > { %941 = vmatpush1.bf16.msra.mxu0 %v3753_v7  ;;  %972 = vmatprep.mubr.bf16.mxu0 %v3624_v4 }
  0x57   : > { %942 = vmatprep.subr.bf16.mxu0 %v3756_v8  ;;  %3123 = vmatpush3.bf16.msra.mxu1 %v3366_v37 }
  0x58   : > { %3128 = vmatprep.subr.bf16.mxu1 %v3625_v19 }
  0x5a   : > { %943 = vmatpush1.bf16.msra.mxu0 %v3760_v9  ;;  %3125 = vmatmul.mubr.bf16.vlgmr.msra.gmra.mxu1 %v508_v34 }
  0x5b   : > { %944 = vmatprep.subr.bf16.mxu0 %v3764_v10  ;;  %3144 = vmatprep.mubr.msk.bf16.mxu1 %vm3626_vm2, %v3625_v19 }
  0x5c   : > { %3129 = vmatpush3.bf16.msra.mxu1 %v3367_v38 }
  0x5d   : > { %3130 = vmatprep.subr.bf16.mxu1 %v3625_v19 }
  0x5e   : > { %945 = vmatpush1.bf16.msra.mxu0 %v3768_v12 }
  0x5f   : > { %946 = vmatprep.subr.bf16.mxu0 %v3770_v13 }
  0x60   : > { %3131 = vmatpush3.bf16.msra.mxu1 %v3368_v39 }
  0x61   : > { %3132 = vmatprep.subr.bf16.mxu1 %v3625_v19 }
  0x62   : > { %947 = vmatpush1.bf16.msra.mxu0 %v3780_v16 }
  0x63   : > { %948 = vmatprep.subr.bf16.mxu0 %v3784_v17 }
  0x64   : > { %3133 = vmatpush3.bf16.msra.mxu1 %v3369_v40 }
  0x65   : > { %3134 = vmatprep.subr.bf16.mxu1 %v3625_v19 }
  0x66   : > { %949 = vmatpush1.bf16.msra.mxu0 %v3788_v21 }
  0x67   : > { %950 = vmatprep.subr.bf16.mxu0 %v3791_v22 }
  0x68   : > { %3135 = vmatpush3.bf16.msra.mxu1 %v3370_v41 }
  0x69   : > { %3136 = vmatprep.subr.bf16.mxu1 %v3625_v19 }
  0x6a   : > { %951 = vmatpush1.bf16.msra.mxu0 %v3798_v24 }
  0x6b   : > { %952 = vmatprep.subr.bf16.mxu0 %v3804_v26 }
  0x6c   : > { %3137 = vmatpush3.bf16.msra.mxu1 %v3371_v42 }
  0x6d   : > { %3138 = vmatprep.subr.bf16.mxu1 %v3625_v19 }
  0x6e   : > { %953 = vmatpush1.bf16.msra.mxu0 %v3806_v28 }
  0x6f   : > { %954 = vmatprep.subr.bf16.mxu0 %v3809_v29 }
  0x70   : > { %3139 = vmatpush3.bf16.msra.mxu1 %v3372_v43 }
  0x71   : > { %3140 = vmatprep.subr.bf16.mxu1 %v3625_v19 }
  0x72   : > { %955 = vmatpush1.bf16.msra.mxu0 %v3814_v31 }
  0x73   : > { %1212 = vmatprep.subr.bf16.mxu0 %v3750_v6 }
  0x74   : > { %3141 = vmatpush3.bf16.msra.mxu1 %v3373_v44 }
  0x75   : > { %3142 = vmatprep.subr.bf16.mxu1 %v3625_v19 }
  0x78   : > { %3143 = vmatpush3.bf16.msra.mxu1 %v3374_v45 }
  0x79   : > { %3148 = vmatprep.subr.bf16.mxu1 %v3625_v19 }
  0xf5   : > { %v366_v50 = vpop.f32.mrf.mxu0 }
  0xf7   : > { %v368_v52 = vpop.f32.mrf.mxu0 }
  0xf9   : > { %v370_v54 = vpop.f32.mrf.mxu0 }
  0xfa   : > { %v3864_v56 = vadd.f32 %v370_v54, %v264_v53  ;;  %v3102_v3 = vpop.f32.mrf.mxu1 }
  0xfb   : > { %v372_v57 = vpop.f32.mrf.mxu0  ;;  %v3874_v11 = vadd.f32 %v3102_v3, %v272_v63 }
  0xfc   : > { %v3866_v59 = vadd.f32 %v372_v57, %v268_v55  ;;  %v439_v15 = vpop.f32.mrf.mxu1 }
  0xfd   : > { %v376_v60 = vpop.f32.mrf.mxu0 }
  0xfe   : > { %v3868_v61 = vadd.f32 %v376_v60, %v264_v53  ;;  %v3103_v23 = vpop.f32.mrf.mxu1  ;;  %v367_v60 = vadd.f32 %v366_v50, %v264_v53 }
  0xff   : > { %v378_v62 = vpop.f32.mrf.mxu0  ;;  %v3880_v27 = vadd.f32 %v3103_v23, %v272_v63 }
 0x100   : > { %v3870_v0 = vadd.f32 %v378_v62, %v268_v55  ;;  %v442_v33 = vpop.f32.mrf.mxu1 }
 0x101   : > { %v380_v1 = vpop.f32.mrf.mxu0  ;;  %v3884_v35 = vadd.f32 %v442_v33, %v272_v63 }
 0x102   : > { %v3872_v2 = vadd.f32 %v380_v1, %v264_v53  ;;  %v3106_v37 = vpop.f32.mrf.mxu1 }
 0x103   : > { %v382_v5 = vpop.f32.mrf.mxu0  ;;  %v3888_v39 = vadd.f32 %v3106_v37, %v272_v63 }
 0x104   : > { %v3876_v14 = vadd.f32 %v382_v5, %v268_v55  ;;  %v455_v41 = vpop.f32.mrf.mxu1 }
 0x105   : > { %v386_v18 = vpop.f32.mrf.mxu0  ;;  %v3892_v43 = vadd.f32 %v455_v41, %v272_v63 }
 0x106   : > { %v3878_v20 = vadd.f32 %v386_v18, %v264_v53  ;;  %v3107_v45 = vpop.f32.mrf.mxu1 }
 0x107   : > { %v388_v25 = vpop.f32.mrf.mxu0  ;;  %v3896_v47 = vadd.f32 %v3107_v45, %v272_v63 }
 0x108   : > { %v3882_v30 = vadd.f32 %v388_v25, %v268_v55  ;;  %v458_v49 = vpop.f32.mrf.mxu1  ;;  %v369_v25 = vadd.f32 %v368_v52, %v268_v55 }
 0x109   : > { %v390_v34 = vpop.f32.mrf.mxu0  ;;  %v3900_v54 = vadd.f32 %v458_v49, %v272_v63 }
 0x10a   : > { %v3886_v36 = vadd.f32 %v390_v34, %v264_v53 }
 0x10b   : > { %v392_v38 = vpop.f32.mrf.mxu0 }
 0x10c   : > { %v3890_v40 = vadd.f32 %v392_v38, %v268_v55 }
 0x10d   : > { %v396_v42 = vpop.f32.mrf.mxu0 }
 0x10e   : > { %v3894_v44 = vadd.f32 %v396_v42, %v264_v53 }
 0x10f   : > { %v398_v46 = vpop.f32.mrf.mxu0 }
 0x110   : > { %v3898_v48 = vadd.f32 %v398_v46, %v268_v55 }
 0x111   : > { %v400_v51 = vpop.f32.mrf.mxu0 }
 0x112   : > { %v3902_v57 = vadd.f32 %v400_v51, %v264_v53  ;;  %v3909_v53 = vld [vmem:[%s4234_s4] ss:$0 sm:$0xff] }
 0x113   : > { %v402_v58 = vpop.f32.mrf.mxu0 }
 0x114   : > { %v3904_v62 = vadd.f32 %v402_v58, %v268_v55  ;;  %v440_v58 = vadd.f32 %v439_v15, %v272_v63  ;;  %v3376_v63 = vld [vmem:[#allocation4 + $0x98] ss:$12 sps:$4 sm:$0xff]   ;;  %v3377_v15 = vld [vmem:[#allocation4 + $0x80] ss:$12 sps:$4 sm:$0xff]  }
 0x115   : > { %v703_v1 = vpop.f32.mrf.mxu0 }
 0x116   : > { %v750_v3 = vadd.f32 %v703_v1, %v367_v60 }
 0x117   : > { %v705_v5 = vpop.f32.mrf.mxu0 }
 0x118   : > { %v2824_v18 = vmul.f32 -1.442695, %v750_v3  ;;  %v757_v34 = vadd.f32 %v705_v5, %v369_v25 }
 0x119   : > { %v707_v23 = vpop.f32.mrf.mxu0 }
 0x11a   : > { %3447 = vpow2.f32 %v2824_v18  ;;  %v2825_v37 = vmul.f32 -1.442695, %v757_v34  ;;  %v744_v38 = vpop.f32.mrf.mxu1 }
 0x11b   : > { %v708_v33 = vpop.f32.mrf.mxu0  ;;  %v764_v55 = vadd.f32 %v3909_v53, %v744_v38  ;;  %v3379_v38 = vld [vmem:[#allocation4 + $0x50] ss:$12 sps:$4 sm:$0xff]  }
 0x11c   : > { %3449 = vpow2.f32 %v2825_v37  ;;  %v3126_v41 = vpop.f32.mrf.mxu1  ;;  %v3378_v37 = vld [vmem:[#allocation4 + $0x68] ss:$12 sps:$4 sm:$0xff]  }
 0x11d   : > { %v3380_v41 = vld [vmem:[#allocation4 + $0x38] ss:$12 sps:$4 sm:$0xff]  }
 0x11e   : > { %v747_v42 = vpop.f32.mrf.mxu1 }
 0x11f   : > { %v3382_v42 = vld [vmem:[#allocation4 + $0x8] ss:$12 sps:$4 sm:$0xff]  }
 0x120   : > { %v3127_v49 = vpop.f32.mrf.mxu1 }
 0x127   : > { %v3448_v45 = vpop.eup %3447 }
 0x128   : > { %v754_v46 = vadd.f32 1.0, %v3448_v45 }
 0x129   : > { %v3450_v50 = vpop.eup %3449 }
 0x12a   : > { %3451 = vrcp.f32 %v754_v46  ;;  %v761_v52 = vadd.f32 1.0, %v3450_v50 }
 0x12c   : > { %3453 = vrcp.f32 %v761_v52 }
 0x137   : > { %v3452_v51 = vpop.eup %3451 }
 0x138   : > { %v765_v60 = vmul.f32 %v3452_v51, %v764_v55 }
 0x139   : > { %v3454_v3 = vpop.eup %3453 }
 0x13a   : > { %v766_v1 = vadd.f32 %v765_v60, %v440_v58  ;;  %v768_v5 = vsub.f32 1.0, %v3454_v3  ;;  %v770_v25 = vmul.f32 %v3454_v3, %v3816_v32  ;;  %v3375_v32 = vld [vmem:[#allocation4 + $0xb0] ss:$12 sps:$4 sm:$0xff]  }
 0x13c   : > { %3455 = vtanh.f32 %v766_v1 }
 0x149   : > { %v3456_v18 = vpop.eup %3455 }
 0x14a   : > { %v769_v23 = vmul.f32 %v3456_v18, %v768_v5 }
 0x14c   : > { %v3913_v33 = vadd.f32 %v770_v25, %v769_v23 }
 0x14e   : > { %772 = vst [vmem:[%s3736_s26] sm:$0xff] %v3913_v33  ;;  %v779_v34 = vpack.c.bf16 %v3913_v33, %v3913_v33 }
 0x150   : > { %973 = vmatmul.mubr.bf16.vlgmr.msra.gmra.mxu0 %v779_v34  ;;  %3145 = vmatmul.mubr.bf16.vlgmr.msra.gmra.mxu1 %v779_v34 }
 0x151   : > { %1213 = vmatpush1.bf16.msra.mxu0 %v3753_v7  ;;  %1244 = vmatprep.mubr.bf16.mxu0 %v3624_v4 }
 0x152   : > { %1214 = vmatprep.subr.bf16.mxu0 %v3756_v8  ;;  %3164 = vmatprep.mubr.msk.bf16.mxu1 %vm3626_vm2, %v3625_v19 }
 0x153   : > { %3149 = vmatpush3.bf16.msra.mxu1 %v3375_v32 }
 0x154   : > { %3150 = vmatprep.subr.bf16.mxu1 %v3625_v19 }
 0x155   : > { %1215 = vmatpush1.bf16.msra.mxu0 %v3760_v9 }
 0x156   : > { %1216 = vmatprep.subr.bf16.mxu0 %v3764_v10 }
 0x157   : > { %3151 = vmatpush3.bf16.msra.mxu1 %v3376_v63 }
 0x158   : > { %3152 = vmatprep.subr.bf16.mxu1 %v3625_v19 }
 0x159   : > { %1217 = vmatpush1.bf16.msra.mxu0 %v3768_v12 }
 0x15a   : > { %1218 = vmatprep.subr.bf16.mxu0 %v3770_v13 }
 0x15b   : > { %3153 = vmatpush3.bf16.msra.mxu1 %v3377_v15 }
 0x15c   : > { %3154 = vmatprep.subr.bf16.mxu1 %v3625_v19 }
 0x15d   : > { %1219 = vmatpush1.bf16.msra.mxu0 %v3780_v16 }
 0x15e   : > { %1220 = vmatprep.subr.bf16.mxu0 %v3784_v17 }
 0x15f   : > { %3155 = vmatpush3.bf16.msra.mxu1 %v3378_v37 }
 0x160   : > { %3156 = vmatprep.subr.bf16.mxu1 %v3625_v19 }
 0x161   : > { %1221 = vmatpush1.bf16.msra.mxu0 %v3788_v21 }
 0x162   : > { %1222 = vmatprep.subr.bf16.mxu0 %v3791_v22 }
 0x163   : > { %3157 = vmatpush3.bf16.msra.mxu1 %v3379_v38 }
 0x164   : > { %3158 = vmatprep.subr.bf16.mxu1 %v3625_v19 }
 0x165   : > { %1223 = vmatpush1.bf16.msra.mxu0 %v3798_v24 }
 0x166   : > { %1224 = vmatprep.subr.bf16.mxu0 %v3804_v26 }
 0x167   : > { %3159 = vmatpush3.bf16.msra.mxu1 %v3380_v41 }
 0x168   : > { %3160 = vmatprep.subr.bf16.mxu1 %v3625_v19 }
 0x169   : > { %1225 = vmatpush1.bf16.msra.mxu0 %v3806_v28 }
 0x16a   : > { %1226 = vmatprep.subr.bf16.mxu0 %v3809_v29 }
 0x16d   : > { %1227 = vmatpush1.bf16.msra.mxu0 %v3814_v31 }
 0x16e   : > { %1484 = vmatprep.subr.bf16.mxu0 %v3750_v6  ;;  %v3381_v6 = vld [vmem:[#allocation4 + $0x20] ss:$12 sps:$4 sm:$0xff]  }
 0x16f   : > { %3161 = vmatpush3.bf16.msra.mxu1 %v3381_v6 }
 0x170   : > { %3162 = vmatprep.subr.bf16.mxu1 %v3625_v19 }
 0x173   : > { %3163 = vmatpush3.bf16.msra.mxu1 %v3382_v42 }
 0x174   : > { %3168 = vmatprep.subr.bf16.mxu1 %v3625_v19 }
 0x210   : > { %v974_v45 = vpop.f32.mrf.mxu0  ;;  %v1015_v46 = vpop.f32.mrf.mxu1 }
 0x211   : > { %v1021_v49 = vadd.f32 %v974_v45, %v3864_v56  ;;  %v1035_v56 = vadd.f32 %v3909_v53, %v1015_v46 }
 0x212   : > { %v976_v50 = vpop.f32.mrf.mxu0  ;;  %v3146_v52 = vpop.f32.mrf.mxu1 }
 0x213   : > { %v2850_v55 = vmul.f32 -1.442695, %v1021_v49  ;;  %v1028_v3 = vadd.f32 %v976_v50, %v3866_v59 }
 0x214   : > { %v978_v51 = vpop.f32.mrf.mxu0  ;;  %v1018_v58 = vpop.f32.mrf.mxu1 }
 0x215   : > { %3457 = vpow2.f32 %v2850_v55  ;;  %v2851_v5 = vmul.f32 -1.442695, %v1028_v3 }
 0x216   : > { %v979_v60 = vpop.f32.mrf.mxu0  ;;  %v3147_v1 = vpop.f32.mrf.mxu1 }
 0x217   : > { %3459 = vpow2.f32 %v2851_v5 }
 0x222   : > { %v3458_v18 = vpop.eup %3457 }
 0x223   : > { %v1025_v23 = vadd.f32 1.0, %v3458_v18 }
 0x224   : > { %v3460_v25 = vpop.eup %3459 }
 0x225   : > { %3461 = vrcp.f32 %v1025_v23  ;;  %v1032_v34 = vadd.f32 1.0, %v3460_v25 }
 0x227   : > { %3463 = vrcp.f32 %v1032_v34 }
 0x232   : > { %v3462_v32 = vpop.eup %3461 }
 0x233   : > { %v1036_v63 = vmul.f32 %v3462_v32, %v1035_v56  ;;  %v3999_v32 = vld [vmem:[#allocation4 + $0xa8] ss:$12 sps:$4 sm:$0xff]  }
 0x234   : > { %v3464_v37 = vpop.eup %3463 }
 0x235   : > { %v1037_v15 = vadd.f32 %v1036_v63, %v3884_v35  ;;  %v1039_v38 = vsub.f32 1.0, %v3464_v37  ;;  %v1041_v6 = vmul.f32 %v3464_v37, %v3913_v33  ;;  %v3394_v63 = vld [vmem:[#allocation4 + $0xb0] ss:$12 sps:$4 sm:$0xff]  }
 0x236   : > { %v4006_v37 = vld [vmem:[#allocation4 + $0x90] ss:$12 sps:$4 sm:$0xff]  }
 0x237   : > { %3465 = vtanh.f32 %v1037_v15  ;;  %v4003_v15 = vld [vmem:[#allocation4 + $0x94] ss:$12 sps:$4 sm:$0xff]  }
 0x244   : > { %v3466_v41 = vpop.eup %3465 }
 0x245   : > { %v1040_v59 = vmul.f32 %v3466_v41, %v1039_v38  ;;  %v3398_v38 = vld [vmem:[#allocation4 + $0x98] ss:$12 sps:$4 sm:$0xff]   ;;  %v4010_v41 = vld [vmem:[#allocation4 + $0x7c] ss:$12 sps:$4 sm:$0xff]  }
 0x247   : > { %v3951_v42 = vadd.f32 %v1041_v6, %v1040_v59  ;;  %v4013_v59 = vld [vmem:[#allocation4 + $0x78] ss:$12 sps:$4 sm:$0xff]   ;;  %v3402_v6 = vld [vmem:[#allocation4 + $0x80] ss:$12 sps:$4 sm:$0xff]  }
 0x249   : > { %2852 = vst [vmem:[%s3736_s26 + $0x8] sm:$0xff] %v3951_v42  ;;  %v1051_v45 = vpack.c.bf16 %v3951_v42, %v3951_v42 }
 0x24b   : > { %1245 = vmatmul.mubr.bf16.vlgmr.msra.gmra.mxu0 %v1051_v45  ;;  %3165 = vmatmul.mubr.bf16.vlgmr.msra.gmra.mxu1 %v1051_v45  ;;  %v4020_v45 = vld [vmem:[#allocation4 + $0x60] ss:$12 sps:$4 sm:$0xff]  }
 0x24c   : > { %1485 = vmatpush1.bf16.msra.mxu0 %v3753_v7  ;;  %1516 = vmatprep.mubr.bf16.mxu0 %v3624_v4  ;;  %v3383_v7 = vld [vmem:[#allocation4 + $0xb0] ss:$12 sps:$4 sm:$0xff]  }
 0x24d   : > { %1486 = vmatprep.subr.bf16.mxu0 %v3756_v8  ;;  %3184 = vmatprep.mubr.msk.bf16.mxu1 %vm3626_vm2, %v3625_v19  ;;  %v3384_v8 = vld [vmem:[#allocation4 + $0x98] ss:$12 sps:$4 sm:$0xff]  }
 0x24e   : > { %3169 = vmatpush3.bf16.msra.mxu1 %v3383_v7  ;;  %v3406_v7 = vld [vmem:[#allocation4 + $0x68] ss:$12 sps:$4 sm:$0xff]  }
 0x24f   : > { %3170 = vmatprep.subr.bf16.mxu1 %v3625_v19 }
 0x250   : > { %1487 = vmatpush1.bf16.msra.mxu0 %v3760_v9  ;;  %v3385_v9 = vld [vmem:[#allocation4 + $0x80] ss:$12 sps:$4 sm:$0xff]  }
 0x251   : > { %1488 = vmatprep.subr.bf16.mxu0 %v3764_v10  ;;  %v3386_v10 = vld [vmem:[#allocation4 + $0x68] ss:$12 sps:$4 sm:$0xff]  }
 0x252   : > { %3171 = vmatpush3.bf16.msra.mxu1 %v3384_v8  ;;  %v4023_v8 = vld [vmem:[#allocation4 + $0x4c] ss:$12 sps:$4 sm:$0xff]  }
 0x253   : > { %3172 = vmatprep.subr.bf16.mxu1 %v3625_v19 }
 0x254   : > { %1489 = vmatpush1.bf16.msra.mxu0 %v3768_v12  ;;  %v3387_v12 = vld [vmem:[#allocation4 + $0x50] ss:$12 sps:$4 sm:$0xff]  }
 0x255   : > { %1490 = vmatprep.subr.bf16.mxu0 %v3770_v13  ;;  %v3388_v13 = vld [vmem:[#allocation4 + $0x38] ss:$12 sps:$4 sm:$0xff]  }
 0x256   : > { %3173 = vmatpush3.bf16.msra.mxu1 %v3385_v9  ;;  %v4026_v9 = vld [vmem:[#allocation4 + $0x48] ss:$12 sps:$4 sm:$0xff]  }
 0x257   : > { %3174 = vmatprep.subr.bf16.mxu1 %v3625_v19 }
 0x258   : > { %1491 = vmatpush1.bf16.msra.mxu0 %v3780_v16  ;;  %v3389_v16 = vld [vmem:[#allocation4 + $0x20] ss:$12 sps:$4 sm:$0xff]  }
 0x259   : > { %1492 = vmatprep.subr.bf16.mxu0 %v3784_v17  ;;  %v3390_v17 = vld [vmem:[#allocation4 + $0x8] ss:$12 sps:$4 sm:$0xff]  }
 0x25a   : > { %3175 = vmatpush3.bf16.msra.mxu1 %v3386_v10  ;;  %v3410_v10 = vld [vmem:[#allocation4 + $0x50] ss:$12 sps:$4 sm:$0xff]  }
 0x25b   : > { %3176 = vmatprep.subr.bf16.mxu1 %v3625_v19 }
 0x25c   : > { %1493 = vmatpush1.bf16.msra.mxu0 %v3788_v21 }
 0x25d   : > { %1494 = vmatprep.subr.bf16.mxu0 %v3791_v22 }
 0x25e   : > { %3177 = vmatpush3.bf16.msra.mxu1 %v3387_v12  ;;  %v4030_v12 = vld [vmem:[#allocation4 + $0x34] ss:$12 sps:$4 sm:$0xff]  }
 0x25f   : > { %3178 = vmatprep.subr.bf16.mxu1 %v3625_v19 }
 0x260   : > { %1495 = vmatpush1.bf16.msra.mxu0 %v3798_v24 }
 0x261   : > { %1496 = vmatprep.subr.bf16.mxu0 %v3804_v26 }
 0x262   : > { %3179 = vmatpush3.bf16.msra.mxu1 %v3388_v13  ;;  %v4033_v13 = vld [vmem:[#allocation4 + $0x30] ss:$12 sps:$4 sm:$0xff]  }
 0x263   : > { %3180 = vmatprep.subr.bf16.mxu1 %v3625_v19 }
 0x264   : > { %1497 = vmatpush1.bf16.msra.mxu0 %v3806_v28 }
 0x265   : > { %1498 = vmatprep.subr.bf16.mxu0 %v3809_v29 }
 0x266   : > { %3181 = vmatpush3.bf16.msra.mxu1 %v3389_v16  ;;  %v3414_v16 = vld [vmem:[#allocation4 + $0x38] ss:$12 sps:$4 sm:$0xff]  }
 0x267   : > { %3182 = vmatprep.subr.bf16.mxu1 %v3625_v19 }
 0x268   : > { %1499 = vmatpush1.bf16.msra.mxu0 %v3814_v31 }
 0x26a   : > { %3183 = vmatpush3.bf16.msra.mxu1 %v3390_v17  ;;  %v4037_v17 = vld [vmem:[#allocation4 + $0x1c] ss:$12 sps:$4 sm:$0xff]  }
 0x26b   : > { %3188 = vmatprep.subr.bf16.mxu1 %v3625_v19 }
 0x30b   : > { %v1246_v21 = vpop.f32.mrf.mxu0  ;;  %v1287_v22 = vpop.f32.mrf.mxu1 }
 0x30c   : > { %v1293_v24 = vadd.f32 %v1246_v21, %v3868_v61  ;;  %v1307_v61 = vadd.f32 %v3909_v53, %v1287_v22  ;;  %v4040_v21 = vld [vmem:[#allocation4 + $0x18] ss:$12 sps:$4 sm:$0xff]   ;;  %v3418_v22 = vld [vmem:[#allocation4 + $0x20] ss:$12 sps:$4 sm:$0xff]  }
 0x30d   : > { %v1248_v26 = vpop.f32.mrf.mxu0  ;;  %v3166_v28 = vpop.f32.mrf.mxu1 }
 0x30e   : > { %v2877_v29 = vmul.f32 -1.442695, %v1293_v24  ;;  %v1300_v49 = vadd.f32 %v1248_v26, %v3870_v0  ;;  %v4044_v24 = vld [vmem:[#allocation4 + $0x4] ss:$12 sps:$4 sm:$0xff]   ;;  %v4047_v26 = vld [vmem:[#allocation4] ss:$12 sps:$4 sm:$0xff]  }
 0x30f   : > { %v1250_v31 = vpop.f32.mrf.mxu0  ;;  %v1290_v35 = vpop.f32.mrf.mxu1  ;;  %v3422_v28 = vld [vmem:[#allocation4 + $0x8] ss:$12 sps:$4 sm:$0xff]  }
 0x310   : > { %3467 = vpow2.f32 %v2877_v29  ;;  %v2878_v50 = vmul.f32 -1.442695, %v1300_v49 }
 0x311   : > { %v1251_v33 = vpop.f32.mrf.mxu0  ;;  %v3167_v46 = vpop.f32.mrf.mxu1 }
 0x312   : > { %3469 = vpow2.f32 %v2878_v50 }
 0x31d   : > { %v3468_v52 = vpop.eup %3467 }
 0x31e   : > { %v1297_v55 = vadd.f32 1.0, %v3468_v52 }
 0x31f   : > { %v3470_v51 = vpop.eup %3469 }
 0x320   : > { %3471 = vrcp.f32 %v1297_v55  ;;  %v1304_v58 = vadd.f32 1.0, %v3470_v51 }
 0x322   : > { %3473 = vrcp.f32 %v1304_v58 }
 0x32d   : > { %v3472_v60 = vpop.eup %3471 }
 0x32e   : > { %v1308_v1 = vmul.f32 %v3472_v60, %v1307_v61 }
 0x32f   : > { %v3474_v5 = vpop.eup %3473 }
 0x330   : > { %v1309_v3 = vadd.f32 %v1308_v1, %v3874_v11  ;;  %v1311_v18 = vsub.f32 1.0, %v3474_v5  ;;  %v1313_v25 = vmul.f32 %v3474_v5, %v3951_v42  ;;  %v3997_v11 = vld [vmem:[#allocation4 + $0xac] ss:$12 sps:$4 sm:$0xff]   ;;  %v4017_v42 = vld [vmem:[#allocation4 + $0x64] ss:$12 sps:$4 sm:$0xff]  }
 0x331   : > { %1756 = vmatprep.subr.bf16.mxu0 %v3997_v11 }
 0x332   : > { %3475 = vtanh.f32 %v1309_v3 }
 0x33f   : > { %v3476_v23 = vpop.eup %3475 }
 0x340   : > { %v1312_v0 = vmul.f32 %v3476_v23, %v1311_v18 }
 0x342   : > { %v3988_v34 = vadd.f32 %v1313_v25, %v1312_v0 }
 0x344   : > { %2879 = vst [vmem:[%s3736_s26 + $0x10] sm:$0xff] %v3988_v34  ;;  %v1323_v56 = vpack.c.bf16 %v3988_v34, %v3988_v34 }
 0x346   : > { %1517 = vmatmul.mubr.bf16.vlgmr.msra.gmra.mxu0 %v1323_v56  ;;  %3185 = vmatmul.mubr.bf16.vlgmr.msra.gmra.mxu1 %v1323_v56 }
 0x347   : > { %1788 = vmatprep.mubr.bf16.mxu0 %v3624_v4  ;;  %3204 = vmatprep.mubr.msk.bf16.mxu1 %vm3626_vm2, %v3625_v19 }
 0x348   : > { %1757 = vmatpush1.bf16.msra.mxu0 %v3999_v32  ;;  %3189 = vmatpush3.bf16.msra.mxu1 %v3394_v63 }
 0x349   : > { %3190 = vmatprep.subr.bf16.mxu1 %v3625_v19  ;;  %1758 = vmatprep.subr.bf16.mxu0 %v4003_v15 }
 0x34c   : > { %1759 = vmatpush1.bf16.msra.mxu0 %v4006_v37  ;;  %3191 = vmatpush3.bf16.msra.mxu1 %v3398_v38 }
 0x34d   : > { %3192 = vmatprep.subr.bf16.mxu1 %v3625_v19  ;;  %1760 = vmatprep.subr.bf16.mxu0 %v4010_v41 }
 0x350   : > { %1761 = vmatpush1.bf16.msra.mxu0 %v4013_v59  ;;  %3193 = vmatpush3.bf16.msra.mxu1 %v3402_v6 }
 0x351   : > { %3194 = vmatprep.subr.bf16.mxu1 %v3625_v19  ;;  %1762 = vmatprep.subr.bf16.mxu0 %v4017_v42 }
 0x354   : > { %1763 = vmatpush1.bf16.msra.mxu0 %v4020_v45  ;;  %3195 = vmatpush3.bf16.msra.mxu1 %v3406_v7 }
 0x355   : > { %1764 = vmatprep.subr.bf16.mxu0 %v4023_v8  ;;  %3196 = vmatprep.subr.bf16.mxu1 %v3625_v19 }
 0x358   : > { %1765 = vmatpush1.bf16.msra.mxu0 %v4026_v9  ;;  %3197 = vmatpush3.bf16.msra.mxu1 %v3410_v10  ;;  %v3425_v10 = vld [vmem:[#allocation4 + $0x80] ss:$12 sps:$4 sm:$0xff]  }
 0x359   : > { %1766 = vmatprep.subr.bf16.mxu0 %v4030_v12  ;;  %3198 = vmatprep.subr.bf16.mxu1 %v3625_v19 }
 0x35c   : > { %1767 = vmatpush1.bf16.msra.mxu0 %v4033_v13  ;;  %3199 = vmatpush3.bf16.msra.mxu1 %v3414_v16  ;;  %v3426_v16 = vld [vmem:[#allocation4 + $0x68] ss:$12 sps:$4 sm:$0xff]  }
 0x35d   : > { %1768 = vmatprep.subr.bf16.mxu0 %v4037_v17  ;;  %3200 = vmatprep.subr.bf16.mxu1 %v3625_v19 }
 0x360   : > { %1769 = vmatpush1.bf16.msra.mxu0 %v4040_v21  ;;  %3201 = vmatpush3.bf16.msra.mxu1 %v3418_v22  ;;  %v3427_v22 = vld [vmem:[#allocation4 + $0x50] ss:$12 sps:$4 sm:$0xff]  }
 0x361   : > { %1770 = vmatprep.subr.bf16.mxu0 %v4044_v24  ;;  %3202 = vmatprep.subr.bf16.mxu1 %v3625_v19 }
 0x364   : > { %1771 = vmatpush1.bf16.msra.mxu0 %v4047_v26  ;;  %3203 = vmatpush3.bf16.msra.mxu1 %v3422_v28  ;;  %v3428_v28 = vld [vmem:[#allocation4 + $0x38] ss:$12 sps:$4 sm:$0xff]  }
 0x365   : > { %2028 = vmatprep.subr.bf16.mxu0 %v3997_v11  ;;  %3208 = vmatprep.subr.bf16.mxu1 %v3625_v19 }
 0x406   : > { %v1518_v29 = vpop.f32.mrf.mxu0  ;;  %v1559_v31 = vpop.f32.mrf.mxu1 }
 0x407   : > { %v1565_v35 = vadd.f32 %v1518_v29, %v3872_v2  ;;  %v1579_v2 = vadd.f32 %v3909_v53, %v1559_v31  ;;  %v3429_v29 = vld [vmem:[#allocation4 + $0x20] ss:$12 sps:$4 sm:$0xff]   ;;  %v3430_v31 = vld [vmem:[#allocation4 + $0x8] ss:$12 sps:$4 sm:$0xff]  }
 0x408   : > { %v1520_v33 = vpop.f32.mrf.mxu0  ;;  %v3186_v46 = vpop.f32.mrf.mxu1 }
 0x409   : > { %v2904_v49 = vmul.f32 -1.442695, %v1565_v35  ;;  %v1572_v58 = vadd.f32 %v1520_v33, %v3876_v14 }
 0x40a   : > { %v1522_v50 = vpop.f32.mrf.mxu0  ;;  %v1562_v52 = vpop.f32.mrf.mxu1 }
 0x40b   : > { %3477 = vpow2.f32 %v2904_v49  ;;  %v2905_v61 = vmul.f32 -1.442695, %v1572_v58 }
 0x40c   : > { %v1523_v55 = vpop.f32.mrf.mxu0  ;;  %v3187_v51 = vpop.f32.mrf.mxu1 }
 0x40d   : > { %3479 = vpow2.f32 %v2905_v61 }
 0x418   : > { %v3478_v60 = vpop.eup %3477 }
 0x419   : > { %v1569_v1 = vadd.f32 1.0, %v3478_v60 }
 0x41a   : > { %v3480_v3 = vpop.eup %3479 }
 0x41b   : > { %3481 = vrcp.f32 %v1569_v1  ;;  %v1576_v5 = vadd.f32 1.0, %v3480_v3 }
 0x41d   : > { %3483 = vrcp.f32 %v1576_v5 }
 0x428   : > { %v3482_v18 = vpop.eup %3481 }
 0x429   : > { %v1580_v23 = vmul.f32 %v3482_v18, %v1579_v2 }
 0x42a   : > { %v3484_v25 = vpop.eup %3483 }
 0x42b   : > { %v1581_v0 = vadd.f32 %v1580_v23, %v3880_v27  ;;  %v1583_v56 = vsub.f32 1.0, %v3484_v25  ;;  %v1585_v38 = vmul.f32 %v3484_v25, %v3988_v34  ;;  %v3423_v27 = vld [vmem:[#allocation4 + $0xb0] ss:$12 sps:$4 sm:$0xff]   ;;  %v3424_v34 = vld [vmem:[#allocation4 + $0x98] ss:$12 sps:$4 sm:$0xff]  }
 0x42d   : > { %3485 = vtanh.f32 %v1581_v0 }
 0x43a   : > { %v3486_v63 = vpop.eup %3485 }
 0x43b   : > { %v1584_v14 = vmul.f32 %v3486_v63, %v1583_v56 }
 0x43d   : > { %v4059_v6 = vadd.f32 %v1585_v38, %v1584_v14 }
 0x43f   : > { %2906 = vst [vmem:[%s3736_s26 + $0x18] sm:$0xff] %v4059_v6  ;;  %v1595_v7 = vpack.c.bf16 %v4059_v6, %v4059_v6 }
 0x441   : > { %1789 = vmatmul.mubr.bf16.vlgmr.msra.gmra.mxu0 %v1595_v7  ;;  %3205 = vmatmul.mubr.bf16.vlgmr.msra.gmra.mxu1 %v1595_v7 }
 0x442   : > { %2029 = vmatpush1.bf16.msra.mxu0 %v3999_v32  ;;  %2060 = vmatprep.mubr.bf16.mxu0 %v3624_v4 }
 0x443   : > { %2030 = vmatprep.subr.bf16.mxu0 %v4003_v15  ;;  %3224 = vmatprep.mubr.msk.bf16.mxu1 %vm3626_vm2, %v3625_v19 }
 0x444   : > { %3209 = vmatpush3.bf16.msra.mxu1 %v3423_v27 }
 0x445   : > { %3210 = vmatprep.subr.bf16.mxu1 %v3625_v19 }
 0x446   : > { %2031 = vmatpush1.bf16.msra.mxu0 %v4006_v37 }
 0x447   : > { %2032 = vmatprep.subr.bf16.mxu0 %v4010_v41 }
 0x448   : > { %3211 = vmatpush3.bf16.msra.mxu1 %v3424_v34  ;;  %v3433_v34 = vld [vmem:[#allocation4 + $0x80] ss:$12 sps:$4 sm:$0xff]  }
 0x449   : > { %3212 = vmatprep.subr.bf16.mxu1 %v3625_v19 }
 0x44a   : > { %2033 = vmatpush1.bf16.msra.mxu0 %v4013_v59 }
 0x44b   : > { %2034 = vmatprep.subr.bf16.mxu0 %v4017_v42 }
 0x44c   : > { %3213 = vmatpush3.bf16.msra.mxu1 %v3425_v10  ;;  %v3434_v10 = vld [vmem:[#allocation4 + $0x68] ss:$12 sps:$4 sm:$0xff]  }
 0x44d   : > { %3214 = vmatprep.subr.bf16.mxu1 %v3625_v19 }
 0x44e   : > { %2035 = vmatpush1.bf16.msra.mxu0 %v4020_v45 }
 0x44f   : > { %2036 = vmatprep.subr.bf16.mxu0 %v4023_v8 }
 0x450   : > { %3215 = vmatpush3.bf16.msra.mxu1 %v3426_v16  ;;  %v3435_v16 = vld [vmem:[#allocation4 + $0x50] ss:$12 sps:$4 sm:$0xff]  }
 0x451   : > { %3216 = vmatprep.subr.bf16.mxu1 %v3625_v19 }
 0x452   : > { %2037 = vmatpush1.bf16.msra.mxu0 %v4026_v9 }
 0x453   : > { %2038 = vmatprep.subr.bf16.mxu0 %v4030_v12 }
 0x454   : > { %3217 = vmatpush3.bf16.msra.mxu1 %v3427_v22  ;;  %v3436_v22 = vld [vmem:[#allocation4 + $0x38] ss:$12 sps:$4 sm:$0xff]  }
 0x455   : > { %3218 = vmatprep.subr.bf16.mxu1 %v3625_v19 }
 0x456   : > { %2039 = vmatpush1.bf16.msra.mxu0 %v4033_v13 }
 0x457   : > { %2040 = vmatprep.subr.bf16.mxu0 %v4037_v17 }
 0x458   : > { %3219 = vmatpush3.bf16.msra.mxu1 %v3428_v28  ;;  %v3438_v28 = vld [vmem:[#allocation4 + $0x8] ss:$12 sps:$4 sm:$0xff]  }
 0x459   : > { %3220 = vmatprep.subr.bf16.mxu1 %v3625_v19 }
 0x45a   : > { %2041 = vmatpush1.bf16.msra.mxu0 %v4040_v21 }
 0x45b   : > { %2042 = vmatprep.subr.bf16.mxu0 %v4044_v24 }
 0x45c   : > { %3221 = vmatpush3.bf16.msra.mxu1 %v3429_v29 }
 0x45d   : > { %3222 = vmatprep.subr.bf16.mxu1 %v3625_v19 }
 0x45e   : > { %2043 = vmatpush1.bf16.msra.mxu0 %v4047_v26 }
 0x45f   : > { %2300 = vmatprep.subr.bf16.mxu0 %v3997_v11 }
 0x460   : > { %3223 = vmatpush3.bf16.msra.mxu1 %v3430_v31 }
 0x461   : > { %3228 = vmatprep.subr.bf16.mxu1 %v3625_v19 }
 0x501   : > { %v1790_v35 = vpop.f32.mrf.mxu0  ;;  %v1831_v33 = vpop.f32.mrf.mxu1 }
 0x502   : > { %v1837_v46 = vadd.f32 %v1790_v35, %v3878_v20  ;;  %v1851_v20 = vadd.f32 %v3909_v53, %v1831_v33 }
 0x503   : > { %v1792_v49 = vpop.f32.mrf.mxu0  ;;  %v3206_v50 = vpop.f32.mrf.mxu1 }
 0x504   : > { %v2931_v52 = vmul.f32 -1.442695, %v1837_v46  ;;  %v1844_v60 = vadd.f32 %v1792_v49, %v3882_v30 }
 0x505   : > { %v1794_v55 = vpop.f32.mrf.mxu0  ;;  %v1834_v51 = vpop.f32.mrf.mxu1 }
 0x506   : > { %3487 = vpow2.f32 %v2931_v52  ;;  %v2932_v1 = vmul.f32 -1.442695, %v1844_v60 }
 0x507   : > { %v1795_v58 = vpop.f32.mrf.mxu0  ;;  %v3207_v61 = vpop.f32.mrf.mxu1 }
 0x508   : > { %3489 = vpow2.f32 %v2932_v1 }
 0x513   : > { %v3488_v3 = vpop.eup %3487 }
 0x514   : > { %v1841_v5 = vadd.f32 1.0, %v3488_v3 }
 0x515   : > { %v3490_v2 = vpop.eup %3489 }
 0x516   : > { %3491 = vrcp.f32 %v1841_v5  ;;  %v1848_v18 = vadd.f32 1.0, %v3490_v2 }
 0x518   : > { %3493 = vrcp.f32 %v1848_v18 }
 0x523   : > { %v3492_v23 = vpop.eup %3491 }
 0x524   : > { %v1852_v0 = vmul.f32 %v3492_v23, %v1851_v20 }
 0x525   : > { %v3494_v56 = vpop.eup %3493 }
 0x526   : > { %v1853_v25 = vadd.f32 %v1852_v0, %v3892_v43  ;;  %v1855_v63 = vsub.f32 1.0, %v3494_v56  ;;  %v1857_v38 = vmul.f32 %v3494_v56, %v4059_v6  ;;  %v3431_v43 = vld [vmem:[#allocation4 + $0xb0] ss:$12 sps:$4 sm:$0xff]   ;;  %v3432_v6 = vld [vmem:[#allocation4 + $0x98] ss:$12 sps:$4 sm:$0xff]  }
 0x528   : > { %3495 = vtanh.f32 %v1853_v25 }
 0x535   : > { %v3496_v14 = vpop.eup %3495 }
 0x536   : > { %v1856_v30 = vmul.f32 %v3496_v14, %v1855_v63 }
 0x538   : > { %v4097_v7 = vadd.f32 %v1857_v38, %v1856_v30 }
 0x53a   : > { %2933 = vst [vmem:[%s3736_s26 + $0x20] sm:$0xff] %v4097_v7  ;;  %v1867_v27 = vpack.c.bf16 %v4097_v7, %v4097_v7 }
 0x53c   : > { %2061 = vmatmul.mubr.bf16.vlgmr.msra.gmra.mxu0 %v1867_v27  ;;  %3225 = vmatmul.mubr.bf16.vlgmr.msra.gmra.mxu1 %v1867_v27 }
 0x53d   : > { %2301 = vmatpush1.bf16.msra.mxu0 %v3999_v32  ;;  %2332 = vmatprep.mubr.bf16.mxu0 %v3624_v4 }
 0x53e   : > { %2302 = vmatprep.subr.bf16.mxu0 %v4003_v15  ;;  %3244 = vmatprep.mubr.msk.bf16.mxu1 %vm3626_vm2, %v3625_v19 }
 0x53f   : > { %3229 = vmatpush3.bf16.msra.mxu1 %v3431_v43 }
 0x540   : > { %3230 = vmatprep.subr.bf16.mxu1 %v3625_v19 }
 0x541   : > { %2303 = vmatpush1.bf16.msra.mxu0 %v4006_v37 }
 0x542   : > { %2304 = vmatprep.subr.bf16.mxu0 %v4010_v41 }
 0x543   : > { %3231 = vmatpush3.bf16.msra.mxu1 %v3432_v6 }
 0x544   : > { %3232 = vmatprep.subr.bf16.mxu1 %v3625_v19 }
 0x545   : > { %2305 = vmatpush1.bf16.msra.mxu0 %v4013_v59 }
 0x546   : > { %2306 = vmatprep.subr.bf16.mxu0 %v4017_v42 }
 0x547   : > { %3233 = vmatpush3.bf16.msra.mxu1 %v3433_v34 }
 0x548   : > { %3234 = vmatprep.subr.bf16.mxu1 %v3625_v19 }
 0x549   : > { %2307 = vmatpush1.bf16.msra.mxu0 %v4020_v45 }
 0x54a   : > { %2308 = vmatprep.subr.bf16.mxu0 %v4023_v8 }
 0x54b   : > { %3235 = vmatpush3.bf16.msra.mxu1 %v3434_v10 }
 0x54c   : > { %3236 = vmatprep.subr.bf16.mxu1 %v3625_v19 }
 0x54d   : > { %2309 = vmatpush1.bf16.msra.mxu0 %v4026_v9 }
 0x54e   : > { %2310 = vmatprep.subr.bf16.mxu0 %v4030_v12 }
 0x54f   : > { %3237 = vmatpush3.bf16.msra.mxu1 %v3435_v16 }
 0x550   : > { %3238 = vmatprep.subr.bf16.mxu1 %v3625_v19 }
 0x551   : > { %2311 = vmatpush1.bf16.msra.mxu0 %v4033_v13 }
 0x552   : > { %2312 = vmatprep.subr.bf16.mxu0 %v4037_v17 }
 0x553   : > { %3239 = vmatpush3.bf16.msra.mxu1 %v3436_v22 }
 0x554   : > { %3240 = vmatprep.subr.bf16.mxu1 %v3625_v19 }
 0x555   : > { %2313 = vmatpush1.bf16.msra.mxu0 %v4040_v21 }
 0x556   : > { %2314 = vmatprep.subr.bf16.mxu0 %v4044_v24 }
 0x559   : > { %2315 = vmatpush1.bf16.msra.mxu0 %v4047_v26 }
 0x55a   : > { %2572 = vmatprep.subr.bf16.mxu0 %v3997_v11  ;;  %v3437_v11 = vld [vmem:[#allocation4 + $0x20] ss:$12 sps:$4 sm:$0xff]  }
 0x55b   : > { %3241 = vmatpush3.bf16.msra.mxu1 %v3437_v11 }
 0x55c   : > { %3242 = vmatprep.subr.bf16.mxu1 %v3625_v19 }
 0x55f   : > { %3243 = vmatpush3.bf16.msra.mxu1 %v3438_v28 }
 0x560   : > { %3248 = vmatprep.subr.bf16.mxu1 %v3625_v19 }
 0x5fc   : > { %v2062_v29 = vpop.f32.mrf.mxu0  ;;  %v2103_v31 = vpop.f32.mrf.mxu1 }
 0x5fd   : > { %v2109_v35 = vadd.f32 %v2062_v29, %v3886_v36  ;;  %v2123_v36 = vadd.f32 %v3909_v53, %v2103_v31 }
 0x5fe   : > { %v2064_v33 = vpop.f32.mrf.mxu0  ;;  %v3226_v46 = vpop.f32.mrf.mxu1 }
 0x5ff   : > { %v2958_v49 = vmul.f32 -1.442695, %v2109_v35  ;;  %v2116_v58 = vadd.f32 %v2064_v33, %v3890_v40 }
 0x600   : > { %v2066_v50 = vpop.f32.mrf.mxu0  ;;  %v2106_v52 = vpop.f32.mrf.mxu1 }
 0x601   : > { %3497 = vpow2.f32 %v2958_v49  ;;  %v2959_v61 = vmul.f32 -1.442695, %v2116_v58 }
 0x602   : > { %v2067_v55 = vpop.f32.mrf.mxu0  ;;  %v3227_v51 = vpop.f32.mrf.mxu1 }
 0x603   : > { %3499 = vpow2.f32 %v2959_v61 }
 0x60e   : > { %v3498_v60 = vpop.eup %3497 }
 0x60f   : > { %v2113_v1 = vadd.f32 1.0, %v3498_v60 }
 0x610   : > { %v3500_v3 = vpop.eup %3499 }
 0x611   : > { %3501 = vrcp.f32 %v2113_v1  ;;  %v2120_v5 = vadd.f32 1.0, %v3500_v3 }
 0x613   : > { %3503 = vrcp.f32 %v2120_v5 }
 0x61e   : > { %v3502_v2 = vpop.eup %3501 }
 0x61f   : > { %v2124_v18 = vmul.f32 %v3502_v2, %v2123_v36 }
 0x620   : > { %v3504_v23 = vpop.eup %3503 }
 0x621   : > { %v2125_v20 = vadd.f32 %v2124_v18, %v3900_v54  ;;  %v2127_v0 = vsub.f32 1.0, %v3504_v23  ;;  %v2129_v56 = vmul.f32 %v3504_v23, %v4097_v7  ;;  %v3440_v54 = vld [vmem:[#allocation4 + $0x98] ss:$12 sps:$4 sm:$0xff]  }
 0x623   : > { %3505 = vtanh.f32 %v2125_v20 }
 0x630   : > { %v3506_v25 = vpop.eup %3505 }
 0x631   : > { %v2128_v40 = vmul.f32 %v3506_v25, %v2127_v0 }
 0x633   : > { %v4135_v63 = vadd.f32 %v2129_v56, %v2128_v40 }
 0x635   : > { %2960 = vst [vmem:[%s3736_s26 + $0x28] sm:$0xff] %v4135_v63  ;;  %v2139_v14 = vpack.c.bf16 %v4135_v63, %v4135_v63 }
 0x637   : > { %2333 = vmatmul.mubr.bf16.vlgmr.msra.gmra.mxu0 %v2139_v14  ;;  %3245 = vmatmul.mubr.bf16.vlgmr.msra.gmra.mxu1 %v2139_v14 }
 0x638   : > { %2573 = vmatpush1.bf16.msra.mxu0 %v3999_v32  ;;  %2604 = vmatprep.mubr.bf16.mxu0 %v3624_v4  ;;  %v3439_v4 = vld [vmem:[#allocation4 + $0xb0] ss:$12 sps:$4 sm:$0xff]   ;;  %v3441_v32 = vld [vmem:[#allocation4 + $0x80] ss:$12 sps:$4 sm:$0xff]  }
 0x639   : > { %2574 = vmatprep.subr.bf16.mxu0 %v4003_v15  ;;  %3264 = vmatprep.mubr.msk.bf16.mxu1 %vm3626_vm2, %v3625_v19  ;;  %v3442_v15 = vld [vmem:[#allocation4 + $0x68] ss:$12 sps:$4 sm:$0xff]  }
 0x63a   : > { %3249 = vmatpush3.bf16.msra.mxu1 %v3439_v4 }
 0x63b   : > { %3250 = vmatprep.subr.bf16.mxu1 %v3625_v19 }
 0x63c   : > { %2575 = vmatpush1.bf16.msra.mxu0 %v4006_v37  ;;  %v3443_v37 = vld [vmem:[#allocation4 + $0x50] ss:$12 sps:$4 sm:$0xff]  }
 0x63d   : > { %2576 = vmatprep.subr.bf16.mxu0 %v4010_v41  ;;  %v3444_v41 = vld [vmem:[#allocation4 + $0x38] ss:$12 sps:$4 sm:$0xff]  }
 0x63e   : > { %3251 = vmatpush3.bf16.msra.mxu1 %v3440_v54 }
 0x63f   : > { %3252 = vmatprep.subr.bf16.mxu1 %v3625_v19 }
 0x640   : > { %2577 = vmatpush1.bf16.msra.mxu0 %v4013_v59  ;;  %v3445_v59 = vld [vmem:[#allocation4 + $0x20] ss:$12 sps:$4 sm:$0xff]  }
 0x641   : > { %2578 = vmatprep.subr.bf16.mxu0 %v4017_v42  ;;  %v3446_v42 = vld [vmem:[#allocation4 + $0x8] ss:$12 sps:$4 sm:$0xff]  }
 0x642   : > { %3253 = vmatpush3.bf16.msra.mxu1 %v3441_v32 }
 0x643   : > { %3254 = vmatprep.subr.bf16.mxu1 %v3625_v19 }
 0x644   : > { %2579 = vmatpush1.bf16.msra.mxu0 %v4020_v45 }
 0x645   : > { %2580 = vmatprep.subr.bf16.mxu0 %v4023_v8 }
 0x646   : > { %3255 = vmatpush3.bf16.msra.mxu1 %v3442_v15 }
 0x647   : > { %3256 = vmatprep.subr.bf16.mxu1 %v3625_v19 }
 0x648   : > { %2581 = vmatpush1.bf16.msra.mxu0 %v4026_v9 }
 0x649   : > { %2582 = vmatprep.subr.bf16.mxu0 %v4030_v12 }
 0x64a   : > { %3257 = vmatpush3.bf16.msra.mxu1 %v3443_v37 }
 0x64b   : > { %3258 = vmatprep.subr.bf16.mxu1 %v3625_v19 }
 0x64c   : > { %2583 = vmatpush1.bf16.msra.mxu0 %v4033_v13 }
 0x64d   : > { %2584 = vmatprep.subr.bf16.mxu0 %v4037_v17 }
 0x64e   : > { %3259 = vmatpush3.bf16.msra.mxu1 %v3444_v41 }
 0x64f   : > { %3260 = vmatprep.subr.bf16.mxu1 %v3625_v19 }
 0x650   : > { %2585 = vmatpush1.bf16.msra.mxu0 %v4040_v21 }
 0x651   : > { %2586 = vmatprep.subr.bf16.mxu0 %v4044_v24 }
 0x652   : > { %3261 = vmatpush3.bf16.msra.mxu1 %v3445_v59 }
 0x653   : > { %3262 = vmatprep.subr.bf16.mxu1 %v3625_v19 }
 0x654   : > { %2587 = vmatpush1.bf16.msra.mxu0 %v4047_v26 }
 0x656   : > { %3263 = vmatpush3.bf16.msra.mxu1 %v3446_v42 }
 0x6f7   : > { %v2334_v45 = vpop.f32.mrf.mxu0  ;;  %v2375_v8 = vpop.f32.mrf.mxu1 }
 0x6f8   : > { %v2381_v9 = vadd.f32 %v2334_v45, %v3894_v44  ;;  %v2395_v44 = vadd.f32 %v3909_v53, %v2375_v8 }
 0x6f9   : > { %v2336_v12 = vpop.f32.mrf.mxu0  ;;  %v3246_v13 = vpop.f32.mrf.mxu1 }
 0x6fa   : > { %v2985_v17 = vmul.f32 -1.442695, %v2381_v9  ;;  %v2388_v38 = vadd.f32 %v2336_v12, %v3898_v48 }
 0x6fb   : > { %v2338_v21 = vpop.f32.mrf.mxu0  ;;  %v2378_v24 = vpop.f32.mrf.mxu1 }
 0x6fc   : > { %3507 = vpow2.f32 %v2985_v17  ;;  %v2986_v7 = vmul.f32 -1.442695, %v2388_v38 }
 0x6fd   : > { %v2339_v26 = vpop.f32.mrf.mxu0  ;;  %v3247_v30 = vpop.f32.mrf.mxu1 }
 0x6fe   : > { %3509 = vpow2.f32 %v2986_v7 }
 0x709   : > { %v3508_v27 = vpop.eup %3507 }
 0x70a   : > { %v2385_v43 = vadd.f32 1.0, %v3508_v27 }
 0x70b   : > { %v3510_v19 = vpop.eup %3509 }
 0x70c   : > { %3511 = vrcp.f32 %v2385_v43  ;;  %v2392_v6 = vadd.f32 1.0, %v3510_v19 }
 0x70e   : > { %3513 = vrcp.f32 %v2392_v6 }
 0x719   : > { %v3512_v34 = vpop.eup %3511 }
 0x71a   : > { %v2396_v10 = vmul.f32 %v3512_v34, %v2395_v44 }
 0x71b   : > { %v3514_v22 = vpop.eup %3513 }
 0x71c   : > { %v2397_v16 = vadd.f32 %v2396_v10, %v3888_v39  ;;  %v2399_v11 = vsub.f32 1.0, %v3514_v22  ;;  %v2401_v29 = vmul.f32 %v3514_v22, %v4135_v63 }
 0x71e   : > { %3515 = vtanh.f32 %v2397_v16 }
 0x72b   : > { %v3516_v28 = vpop.eup %3515 }
 0x72c   : > { %v2400_v48 = vmul.f32 %v3516_v28, %v2399_v11 }
 0x72e   : > { %v2402_v31 = vadd.f32 %v2401_v29, %v2400_v48 }
 0x730   : > { %2987 = vst [vmem:[%s3736_s26 + $0x30] sm:$0xff] %v2402_v31  ;;  %v2411_v35 = vpack.c.bf16 %v2402_v31, %v2402_v31 }
 0x732   : > { %2605 = vmatmul.mubr.bf16.vlgmr.msra.gmra.mxu0 %v2411_v35  ;;  %3265 = vmatmul.mubr.bf16.vlgmr.msra.gmra.mxu1 %v2411_v35 }
 0x7f2   : > { %v2606_v33 = vpop.f32.mrf.mxu0  ;;  %v2647_v46 = vpop.f32.mrf.mxu1 }
 0x7f3   : > { %v2653_v53 = vadd.f32 %v2606_v33, %v3902_v57  ;;  %v3527_v57 = vld [vmem:[%s4234_s4] ss:$0 sm:$0xff] }
 0x7f4   : > { %v2608_v49 = vpop.f32.mrf.mxu0  ;;  %v3266_v50 = vpop.f32.mrf.mxu1  ;;  %v2667_v2 = vadd.f32 %v3527_v57, %v2647_v46 }
 0x7f5   : > { %v3012_v52 = vmul.f32 -1.442695, %v2653_v53  ;;  %v2660_v61 = vadd.f32 %v2608_v49, %v3904_v62 }
 0x7f6   : > { %v2610_v39 = vpop.f32.mrf.mxu0  ;;  %v2650_v55 = vpop.f32.mrf.mxu1 }
 0x7f7   : > { %3517 = vpow2.f32 %v3012_v52  ;;  %v3013_v60 = vmul.f32 -1.442695, %v2660_v61 }
 0x7f8   : > { %v2611_v51 = vpop.f32.mrf.mxu0  ;;  %v3267_v58 = vpop.f32.mrf.mxu1 }
 0x7f9   : > { %3519 = vpow2.f32 %v3013_v60 }
 0x804   : > { %v3518_v1 = vpop.eup %3517 }
 0x805   : > { %v2657_v3 = vadd.f32 1.0, %v3518_v1 }
 0x806   : > { %v3520_v5 = vpop.eup %3519 }
 0x807   : > { %3521 = vrcp.f32 %v2657_v3  ;;  %v2664_v36 = vadd.f32 1.0, %v3520_v5 }
 0x809   : > { %3523 = vrcp.f32 %v2664_v36 }
 0x814   : > { %v3522_v18 = vpop.eup %3521 }
 0x815   : > { %v2668_v20 = vmul.f32 %v3522_v18, %v2667_v2 }
 0x816   : > { %v3524_v23 = vpop.eup %3523 }
 0x817   : > { %v2669_v62 = vadd.f32 %v2668_v20, %v3896_v47  ;;  %v2671_v0 = vsub.f32 1.0, %v3524_v23  ;;  %v2673_v56 = vmul.f32 %v3524_v23, %v2402_v31 }
 0x819   : > { %3525 = vtanh.f32 %v2669_v62 }
 0x826   : > { %v3526_v25 = vpop.eup %3525 }
 0x827   : > { %v2672_v40 = vmul.f32 %v3526_v25, %v2671_v0 }
 0x829   : > { %v2674_v47 = vadd.f32 %v2673_v56, %v2672_v40 }
 0x82b   : > { %3014 = vst [vmem:[%s3736_s26 + $0x38] sm:$0xff] %v2674_v47  ;;  %2677 = vst [vmem:[#allocation3] sm:$0xff] %v2674_v47 }
 0x82c   : > { %3567 = shalt.err (!%p3564_p1)
}
 0x82d   : > { %s3568_s13 = scalar_lea.hbm %s4183_s7, 1024  ;;  %s3572_s14 = scalar_lea.hbm %s4235_s5, 2048 }
 0x82e   : > { %p3569_p2 = scmp.ne.s32.totalorder %s4183_s7, %s3568_s13  ;;  %p3573_p7 = scmp.lt.s32.totalorder %s4183_s7, %s4235_s5 }
 0x82f   : > { %p3574_p6 = scmp.lt.s32.totalorder %s3572_s14, %s3568_s13 }
 0x830   : > { %p3570_p3 = pnand %p3569_p2, %p3698_p5 }
 0x831   : > { %p3575_p8 = por %p3574_p6, %p3573_p7 }
 0x832   : > { %p3571_p4 = pneg %p3570_p3 }
 0x834   : > { %p3576_p9 = pnand %p3575_p8, %p3571_p4 }
 0x836   : > { %3579 = shalt.err (!%p3576_p9)
}
 0x837   : > { %s3628_s17 = smov 128   ;;  %s3629_s23 = smov 8  }
 0x838   : > { %3273 = dma.vmem_to_hbm [thread:$0]  (%p3698_p5), %s4185_s25, 1024, %s4183_s7, %s4190_s8, %s3628_s17, %s3628_s17, %s3629_s23  }
 0x839 PF: > { %p3285_p10 = scmp.ge.s32.totalorder %s3618_s21, 2  ;;  %s2707_s30 = sand.u32 1, %s3606_s18  }
 0x83a   : > { %p4240_p11 = scmp.ne.s32.totalorder %s4237_s29, 0  ;;  %s2708_s6 = scalar_lea.sflag [#allocation6], %s2707_s30 }
 0x83c   : > { %p3280_p12 = pnand %p3285_p10, %p4240_p11 }
 0x83e   : > { %p3281_p13 = pneg %p3280_p12 }
 0x840   : > { %3601 = dma.done.wait (%p3281_p13), %s2708_s6, 1024  }
 0x841   : > { %3603 = vsyncadd (%p3281_p13), %s2708_s6, 4294966272  ;;  %p16_p0 = scmp.ge.s32.totalorder %s3685_s24, 4   ;;  %s4241_s18 = smov %s3610_s19 }
 0x842   : > { %s4242_s19 = smov %s3614_s20  ;;  %s4243_s20 = smov %s3696_s27 }
 0x843   : > { %s4244_s21 = smov %s3685_s24  ;;  %18 = sbr.rel (!%p16_p0) target bundleno = 4 (0x4), region = 99 }
 0x848   :  { %2713 = vsyncpa [#allocation5], 1 }
 0x849   :  { %2715 = vsyncpa [#allocation5 + $0x1], 1 }
 0x84a   :  { %2716 = vsyncpa [#allocation6], 1 }
 0x84b   :  { %2718 = vsyncpa [#allocation6 + $0x1], 1 }

</bundles_post_ra>
